<compile_context>
chip_gen: v5e
topology: v5e:2x2
jax: 0.10.0
libtpu: 0.0.40
codegen_flags: <defaults>
</compile_context>

<pallas_src>
import math
import jax
import jax.numpy as jnp
from jax.experimental import pallas as pl
from jax.experimental.pallas import tpu as pltpu

# --- model hyper-parameters (small, consistent with SeqBERT.__init__) -------
D_MODEL  = 32
VOCAB    = 64
MAX_LEN  = 16
PAD_ID   = 0
D_FF     = 64
D_Q = D_K = D_V = 16
N_HEADS  = 2
N_LAYERS = 2
N_SEG    = 2
BATCH    = 2
SEQ      = 8
LN_EPS   = 1e-5
LANE     = 128            # pad tiny output feature dims to one full lane width


# --- shared math helpers (kernel + pure-JAX reference) -----------------------
def _gelu_exact(x):
    # PyTorch nn.GELU() default = exact erf formulation
    return 0.5 * x * (1.0 + jax.lax.erf(x * (1.0 / math.sqrt(2.0))))


def _layernorm(x, gamma, beta):
    mean = jnp.mean(x, axis=-1, keepdims=True)
    var = jnp.mean(jnp.square(x - mean), axis=-1, keepdims=True)
    return (x - mean) * jax.lax.rsqrt(var + LN_EPS) * gamma + beta


# ----------------------------- fused Pallas kernel ----------------------------
def _seqbert_kernel(emb_ref, mask_ref,
                    emb_g_ref, emb_b_ref,
                    wqkv_ref, bqkv_ref, wo_ref, bo_ref, lng_ref, lnb_ref,
                    w1_ref, b1_ref, w2_ref, b2_ref,
                    lin_w_ref, lin_b_ref, et_ref,
                    fc_w_ref, fc_b_ref, cls_w_ref, cls_b_ref,
                    lm_ref, cls_ref):
    B, S, D, H = BATCH, SEQ, D_MODEL, N_HEADS
    Dh, Dv = D_K, D_V
    HD = H * Dh
    scale = 1.0 / math.sqrt(Dh)

    # embedding LayerNorm on all B*S rows at once
    x = _layernorm(emb_ref[...], emb_g_ref[...], emb_b_ref[...])        # (B*S, D)
    mask = mask_ref[...]                                                 # (B*H, 1, S): -1e9 on pad key cols

    # encoder layers, statically unrolled; activations stay on-core
    for l in range(N_LAYERS):
        # fused Q/K/V projection: one lane-dense 2D matmul + one (1,96) bias add
        qkv = jnp.dot(x, wqkv_ref[l],
                      preferred_element_type=jnp.float32) + bqkv_ref[l]  # (B*S, 3*H*Dh)
        qkv = qkv.reshape(B, S, 3 * HD)                                  # leading-dim split (layout-free)
        q_all = qkv[:, :, 0:HD]                                          # (B, S, H*Dh)
        k_all = qkv[:, :, HD:2 * HD]
        v_all = qkv[:, :, 2 * HD:3 * HD]

        # head-major stack -> single dot-batch axis of size H*B = 4
        q = jnp.concatenate([q_all[:, :, h * Dh:(h + 1) * Dh] for h in range(H)], axis=0)
        k = jnp.concatenate([k_all[:, :, h * Dh:(h + 1) * Dh] for h in range(H)], axis=0)
        v = jnp.concatenate([v_all[:, :, h * Dv:(h + 1) * Dv] for h in range(H)], axis=0)

        s = jax.lax.dot_general(
            q, k, (((2,), (2,)), ((0,), (0,))),
            preferred_element_type=jnp.float32) * scale                  # (H*B, S, S)
        s = s + mask                                                     # masked_fill(-1e9) equivalent
        s = s - jnp.max(s, axis=-1, keepdims=True)                       # keep guard for fully-padded rows
        p = jnp.exp(s)
        p = p * pl.reciprocal(jnp.sum(p, axis=-1, keepdims=True), approx=True)

        ctx = jax.lax.dot_general(
            p, v, (((2,), (1,)), ((0,), (0,))),
            preferred_element_type=jnp.float32)                          # (H*B, S, Dv)
        # undo head-major stacking: lane-concat heads -> (B, S, H*Dv) -> (B*S, H*Dv)
        ctx = jnp.concatenate([ctx[h * B:(h + 1) * B] for h in range(H)], axis=-1)
        ctx = ctx.reshape(B * S, H * Dv)

        # output projection: single lane-dense (B*S, H*Dv) @ (H*Dv, D)
        attn_out = jnp.dot(ctx, wo_ref[l],
                           preferred_element_type=jnp.float32) + bo_ref[l]   # (B*S, D)

        ln = _layernorm(attn_out + x, lng_ref[l], lnb_ref[l])            # residual + LayerNorm
        h1 = _gelu_exact(jnp.dot(ln, w1_ref[l],
                                 preferred_element_type=jnp.float32) + b1_ref[l])
        x = jnp.dot(h1, w2_ref[l],
                    preferred_element_type=jnp.float32) + b2_ref[l]      # no residual after FFN (as in PyTorch)

    # LM head (weight tied to token embedding; lane-padded to 128 for dense stores)
    hm = _gelu_exact(jnp.dot(x, lin_w_ref[...],
                             preferred_element_type=jnp.float32) + lin_b_ref[...])
    lm_ref[...] = jnp.dot(hm, et_ref[...],
                          preferred_element_type=jnp.float32).astype(lm_ref.dtype)

    # pooler + classifier on the CLS token rows (row b*S of the folded layout)
    # TODO(synk): nn.Dropout inside self.fc is identity at inference; randomness not modeled.
    cls_tok = jnp.concatenate([x[b * S:b * S + 1, :] for b in range(B)], axis=0)   # (B, D)
    pooled = jnp.tanh(jnp.dot(cls_tok, fc_w_ref[...],
                              preferred_element_type=jnp.float32) + fc_b_ref[...])
    cls_ref[...] = (jnp.dot(pooled, cls_w_ref[...],
                            preferred_element_type=jnp.float32)
                    + cls_b_ref[...]).astype(cls_ref.dtype)


# ----------------------------- wrapper ----------------------------------------
def _pack_weights(params):
    layers = params['layers']
    return dict(
        emb_g=params['emb_g'], emb_b=params['emb_b'],
        # fused QKV: (L, D, 3*H*Dh) and (L, 1, 3*H*Dh); head-major column order
        # matches PyTorch's .view(B, S, H, Dh) split of each projection.
        wqkv=jnp.stack([jnp.concatenate([lp['wq'], lp['wk'], lp['wv']], axis=1)
                        for lp in layers]),
        bqkv=jnp.stack([jnp.concatenate([lp['bq'], lp['bk'], lp['bv']], axis=1)
                        for lp in layers]),
        wo=jnp.stack([lp['wo'] for lp in layers]),        # (L, H*Dv, D)
        bo=jnp.stack([lp['bo'] for lp in layers]),
        ln_g=jnp.stack([lp['ln_g'] for lp in layers]),
        ln_b=jnp.stack([lp['ln_b'] for lp in layers]),
        w1=jnp.stack([lp['w1'] for lp in layers]),
        b1=jnp.stack([lp['b1'] for lp in layers]),
        w2=jnp.stack([lp['w2'] for lp in layers]),
        b2=jnp.stack([lp['b2'] for lp in layers]),
        lin_w=params['lin_w'], lin_b=params['lin_b'],
        et=jnp.pad(params['tok'].T, ((0, 0), (0, LANE - VOCAB))),        # lane-dense tied LM head
        fc_w=params['fc_w'], fc_b=params['fc_b'],
        cls_w=jnp.pad(params['cls_w'], ((0, 0), (0, LANE - 2))),
        cls_b=jnp.pad(params['cls_b'], ((0, 0), (0, LANE - 2))),
    )


def seqbert_forward(params, input_ids, segment_ids):
    B, S = input_ids.shape
    pos = jnp.arange(S, dtype=jnp.int32)
    # embedding gathers are glue; sum in XLA, LayerNorm + everything else in-kernel
    emb = (params['tok'][input_ids]
           + params['pos'][pos][None, :, :]
           + params['seg'][segment_ids]).astype(jnp.float32)
    emb2d = emb.reshape(B * S, D_MODEL)

    # pad-mask bias, pre-tiled to the head-major (H*B, 1, S) dot-batch order
    mask_b = jnp.where(input_ids == PAD_ID, -1e9, 0.0).astype(jnp.float32).reshape(B, 1, S)
    mask_bh = jnp.tile(mask_b, (N_HEADS, 1, 1))                          # (H*B, 1, S)

    w = _pack_weights(params)
    weight_args = [w['emb_g'], w['emb_b'],
                   w['wqkv'], w['bqkv'], w['wo'], w['bo'], w['ln_g'], w['ln_b'],
                   w['w1'], w['b1'], w['w2'], w['b2'],
                   w['lin_w'], w['lin_b'], w['et'],
                   w['fc_w'], w['fc_b'], w['cls_w'], w['cls_b']]

    # Single program, no grid: every input/output is a whole-array VMEM block.
    # Total resident footprint (weights + activations, tile-padded) << 1 MiB,
    # so this fits every generation's VMEM with huge headroom (incl. v7x 64 MiB).
    lm_pad, cls_pad = pl.pallas_call(
        _seqbert_kernel,
        out_shape=(jax.ShapeDtypeStruct((B * S, LANE), jnp.float32),
                   jax.ShapeDtypeStruct((B, LANE), jnp.float32)),
    )(emb2d, mask_bh, *weight_args)

    logits_lm = lm_pad[:, :VOCAB].reshape(B, S, VOCAB)
    logits_clsf = cls_pad[:, :2]
    return logits_lm, logits_clsf


# ----------------------------- pure-JAX reference ------------------------------
def seqbert_reference(params, input_ids, segment_ids):
    B, S = input_ids.shape
    pos = jnp.arange(S, dtype=jnp.int32)
    emb = (params['tok'][input_ids] + params['pos'][pos][None] + params['seg'][segment_ids])
    output = _layernorm(emb, params['emb_g'][0], params['emb_b'][0])
    pad = (input_ids == PAD_ID)[:, None, None, :]            # (B,1,1,S)
    for lp in params['layers']:
        q = output @ lp['wq'] + lp['bq'][0]
        k = output @ lp['wk'] + lp['bk'][0]
        v = output @ lp['wv'] + lp['bv'][0]
        sh = lambda t, d: t.reshape(B, S, N_HEADS, d).transpose(0, 2, 1, 3)
        qh, kh, vh = sh(q, D_Q), sh(k, D_K), sh(v, D_V)
        s = jnp.einsum('bhqd,bhkd->bhqk', qh, kh) / math.sqrt(D_K)
        s = jnp.where(pad, -1e9, s)
        p = jax.nn.softmax(s, axis=-1)
        ctx = jnp.einsum('bhqk,bhkd->bhqd', p, vh).transpose(0, 2, 1, 3)
        ctx = ctx.reshape(B, S, N_HEADS * D_V)
        attn_out = ctx @ lp['wo'] + lp['bo'][0]
        ln = _layernorm(attn_out + output, lp['ln_g'][0], lp['ln_b'][0])
        h1 = _gelu_exact(ln @ lp['w1'] + lp['b1'][0])
        output = h1 @ lp['w2'] + lp['b2'][0]
    pooled = jnp.tanh(output[:, 0] @ params['fc_w'] + params['fc_b'][0])
    logits_clsf = pooled @ params['cls_w'] + params['cls_b'][0]
    h_masked = _gelu_exact(output @ params['lin_w'] + params['lin_b'][0])
    logits_lm = h_masked @ params['tok'].T
    return logits_lm, logits_clsf


# ----------------------------- parameter init ----------------------------------
def init_params(key):
    def nrm(k, shape, scale=0.02):
        return scale * jax.random.normal(k, shape, dtype=jnp.float32)
    keys = iter(jax.random.split(key, 16 + 16 * N_LAYERS))
    tok = nrm(next(keys), (VOCAB, D_MODEL))
    tok = tok.at[PAD_ID].set(0.0)                    # padding_idx row zeroed
    params = dict(
        tok=tok,
        pos=nrm(next(keys), (MAX_LEN, D_MODEL)),
        seg=nrm(next(keys), (N_SEG, D_MODEL)),
        emb_g=1.0 + nrm(next(keys), (1, D_MODEL), 0.1),
        emb_b=nrm(next(keys), (1, D_MODEL)),
        fc_w=nrm(next(keys), (D_MODEL, D_MODEL)),
        fc_b=nrm(next(keys), (1, D_MODEL)),
        cls_w=nrm(next(keys), (D_MODEL, 2)),
        cls_b=nrm(next(keys), (1, 2)),
        lin_w=nrm(next(keys), (D_MODEL, D_MODEL)),
        lin_b=nrm(next(keys), (1, D_MODEL)),
        layers=[],
    )
    for _ in range(N_LAYERS):
        lp = dict(
            wq=nrm(next(keys), (D_MODEL, N_HEADS * D_Q)),
            bq=nrm(next(keys), (1, N_HEADS * D_Q)),
            wk=nrm(next(keys), (D_MODEL, N_HEADS * D_K)),
            bk=nrm(next(keys), (1, N_HEADS * D_K)),
            wv=nrm(next(keys), (D_MODEL, N_HEADS * D_V)),
            bv=nrm(next(keys), (1, N_HEADS * D_V)),
            wo=nrm(next(keys), (N_HEADS * D_V, D_MODEL)),
            bo=nrm(next(keys), (1, D_MODEL)),
            ln_g=1.0 + nrm(next(keys), (1, D_MODEL), 0.1),
            ln_b=nrm(next(keys), (1, D_MODEL)),
            w1=nrm(next(keys), (D_MODEL, D_FF)),
            b1=nrm(next(keys), (1, D_FF)),
            w2=nrm(next(keys), (D_FF, D_MODEL)),
            b2=nrm(next(keys), (1, D_MODEL)),
        )
        params['layers'].append(lp)
    return params


if __name__ == "__main__":
    key = jax.random.PRNGKey(0)
    pkey, ikey, skey = jax.random.split(key, 3)
    params = init_params(pkey)

    input_ids = jax.random.randint(ikey, (BATCH, SEQ), 1, VOCAB, dtype=jnp.int32)
    input_ids = input_ids.at[:, -2:].set(PAD_ID)     # exercise the pad attention mask
    segment_ids = jax.random.randint(skey, (BATCH, SEQ), 0, N_SEG, dtype=jnp.int32)

    fwd = jax.jit(seqbert_forward)
    logits_lm, logits_clsf = jax.block_until_ready(fwd(params, input_ids, segment_ids))

    # sanity check against a pure-JAX reference with identical math
    ref_lm, ref_clsf = seqbert_reference(params, input_ids, segment_ids)
    assert logits_lm.shape == (BATCH, SEQ, VOCAB)
    assert logits_clsf.shape == (BATCH, 2)
    assert jnp.allclose(logits_lm, ref_lm, atol=1e-2, rtol=1e-2)
    assert jnp.allclose(logits_clsf, ref_clsf, atol=1e-2, rtol=1e-2)

    print("KERNEL_OK")
</pallas_src>

<mosaic_0001>
module attributes {stable_mosaic.version = 11 : i64} {
  func.func @_seqbert_kernel(%arg0: memref<16x32xf32, #tpu.memory_space<vmem>>, %arg1: memref<4x1x8xf32, #tpu.memory_space<vmem>>, %arg2: memref<1x32xf32, #tpu.memory_space<vmem>>, %arg3: memref<1x32xf32, #tpu.memory_space<vmem>>, %arg4: memref<2x32x96xf32, #tpu.memory_space<vmem>>, %arg5: memref<2x1x96xf32, #tpu.memory_space<vmem>>, %arg6: memref<2x32x32xf32, #tpu.memory_space<vmem>>, %arg7: memref<2x1x32xf32, #tpu.memory_space<vmem>>, %arg8: memref<2x1x32xf32, #tpu.memory_space<vmem>>, %arg9: memref<2x1x32xf32, #tpu.memory_space<vmem>>, %arg10: memref<2x32x64xf32, #tpu.memory_space<vmem>>, %arg11: memref<2x1x64xf32, #tpu.memory_space<vmem>>, %arg12: memref<2x64x32xf32, #tpu.memory_space<vmem>>, %arg13: memref<2x1x32xf32, #tpu.memory_space<vmem>>, %arg14: memref<32x32xf32, #tpu.memory_space<vmem>>, %arg15: memref<1x32xf32, #tpu.memory_space<vmem>>, %arg16: memref<32x128xf32, #tpu.memory_space<vmem>>, %arg17: memref<32x32xf32, #tpu.memory_space<vmem>>, %arg18: memref<1x32xf32, #tpu.memory_space<vmem>>, %arg19: memref<32x128xf32, #tpu.memory_space<vmem>>, %arg20: memref<1x128xf32, #tpu.memory_space<vmem>>, %arg21: memref<16x128xf32, #tpu.memory_space<vmem>>, %arg22: memref<2x128xf32, #tpu.memory_space<vmem>>) attributes {dimension_semantics = [], scalar_prefetch = 0 : i64, scratch_operands = 0 : i64, tpu.core_type = #tpu.core_type<tc>} {
    %c0 = arith.constant 0 : index
    %c0_0 = arith.constant 0 : index
    %0 = vector.load %arg0[%c0, %c0_0] : memref<16x32xf32, #tpu.memory_space<vmem>>, vector<16x32xf32>
    %c0_1 = arith.constant 0 : index
    %c0_2 = arith.constant 0 : index
    %1 = vector.load %arg2[%c0_1, %c0_2] : memref<1x32xf32, #tpu.memory_space<vmem>>, vector<1x32xf32>
    %c0_3 = arith.constant 0 : index
    %c0_4 = arith.constant 0 : index
    %2 = vector.load %arg3[%c0_3, %c0_4] : memref<1x32xf32, #tpu.memory_space<vmem>>, vector<1x32xf32>
    %cst = arith.constant dense<0.000000e+00> : vector<16xf32>
    %3 = vector.multi_reduction <add>, %0, %cst [1] : vector<16x32xf32> to vector<16xf32>
    %4 = vector.shape_cast %3 : vector<16xf32> to vector<16x1xf32>
    %cst_5 = arith.constant 3.200000e+01 : f32
    %5 = vector.broadcast %cst_5 : f32 to vector<16x1xf32>
    %6 = arith.divf %4, %5 : vector<16x1xf32>
    %7 = vector.broadcast %6 : vector<16x1xf32> to vector<16x32xf32>
    %8 = arith.subf %0, %7 : vector<16x32xf32>
    %9 = arith.mulf %8, %8 : vector<16x32xf32>
    %cst_6 = arith.constant dense<0.000000e+00> : vector<16xf32>
    %10 = vector.multi_reduction <add>, %9, %cst_6 [1] : vector<16x32xf32> to vector<16xf32>
    %11 = vector.shape_cast %10 : vector<16xf32> to vector<16x1xf32>
    %cst_7 = arith.constant 3.200000e+01 : f32
    %12 = vector.broadcast %cst_7 : f32 to vector<16x1xf32>
    %13 = arith.divf %11, %12 : vector<16x1xf32>
    %14 = vector.broadcast %6 : vector<16x1xf32> to vector<16x32xf32>
    %15 = arith.subf %0, %14 : vector<16x32xf32>
    %cst_8 = arith.constant 9.99999974E-6 : f32
    %16 = vector.broadcast %cst_8 : f32 to vector<16x1xf32>
    %17 = arith.addf %13, %16 : vector<16x1xf32>
    %18 = math.rsqrt %17 : vector<16x1xf32>
    %19 = vector.broadcast %18 : vector<16x1xf32> to vector<16x32xf32>
    %20 = arith.mulf %15, %19 : vector<16x32xf32>
    %21 = vector.broadcast %1 : vector<1x32xf32> to vector<16x32xf32>
    %22 = arith.mulf %20, %21 : vector<16x32xf32>
    %23 = vector.broadcast %2 : vector<1x32xf32> to vector<16x32xf32>
    %24 = arith.addf %22, %23 : vector<16x32xf32>
    %c0_9 = arith.constant 0 : index
    %c0_10 = arith.constant 0 : index
    %c0_11 = arith.constant 0 : index
    %25 = vector.load %arg1[%c0_9, %c0_10, %c0_11] : memref<4x1x8xf32, #tpu.memory_space<vmem>>, vector<4x1x8xf32>
    %c0_12 = arith.constant 0 : index
    %c0_13 = arith.constant 0 : index
    %c0_14 = arith.constant 0 : index
    %26 = vector.load %arg4[%c0_12, %c0_13, %c0_14] : memref<2x32x96xf32, #tpu.memory_space<vmem>>, vector<1x32x96xf32>
    %27 = vector.shape_cast %26 : vector<1x32x96xf32> to vector<32x96xf32>
    %cst_15 = arith.constant dense<0.000000e+00> : vector<16x96xf32>
    %28 = tpu.matmul %24, %27, %cst_15 {dimension_numbers = #tpu.dot_dimension_numbers<[1], [0], [0], [1], [0, 0, 1, 1], [], []>} : vector<16x32xf32>, vector<32x96xf32>, vector<16x96xf32> -> vector<16x96xf32>
    %c0_16 = arith.constant 0 : index
    %c0_17 = arith.constant 0 : index
    %c0_18 = arith.constant 0 : index
    %29 = vector.load %arg5[%c0_16, %c0_17, %c0_18] : memref<2x1x96xf32, #tpu.memory_space<vmem>>, vector<1x1x96xf32>
    %30 = vector.shape_cast %29 : vector<1x1x96xf32> to vector<1x96xf32>
    %31 = vector.broadcast %30 : vector<1x96xf32> to vector<16x96xf32>
    %32 = arith.addf %28, %31 : vector<16x96xf32>
    %33 = vector.shape_cast %32 : vector<16x96xf32> to vector<2x8x96xf32>
    %34 = vector.extract_strided_slice %33 {offsets = [0, 0, 0], sizes = [2, 8, 32], strides = [1, 1, 1]} : vector<2x8x96xf32> to vector<2x8x32xf32>
    %35 = vector.extract_strided_slice %33 {offsets = [0, 0, 32], sizes = [2, 8, 32], strides = [1, 1, 1]} : vector<2x8x96xf32> to vector<2x8x32xf32>
    %36 = vector.extract_strided_slice %33 {offsets = [0, 0, 64], sizes = [2, 8, 32], strides = [1, 1, 1]} : vector<2x8x96xf32> to vector<2x8x32xf32>
    %37 = vector.extract_strided_slice %34 {offsets = [0, 0, 0], sizes = [2, 8, 16], strides = [1, 1, 1]} : vector<2x8x32xf32> to vector<2x8x16xf32>
    %38 = vector.extract_strided_slice %34 {offsets = [0, 0, 16], sizes = [2, 8, 16], strides = [1, 1, 1]} : vector<2x8x32xf32> to vector<2x8x16xf32>
    %39 = tpu.concatenate %37, %38 in 0 : vector<2x8x16xf32>, vector<2x8x16xf32> -> vector<4x8x16xf32>
    %40 = vector.extract_strided_slice %35 {offsets = [0, 0, 0], sizes = [2, 8, 16], strides = [1, 1, 1]} : vector<2x8x32xf32> to vector<2x8x16xf32>
    %41 = vector.extract_strided_slice %35 {offsets = [0, 0, 16], sizes = [2, 8, 16], strides = [1, 1, 1]} : vector<2x8x32xf32> to vector<2x8x16xf32>
    %42 = tpu.concatenate %40, %41 in 0 : vector<2x8x16xf32>, vector<2x8x16xf32> -> vector<4x8x16xf32>
    %43 = vector.extract_strided_slice %36 {offsets = [0, 0, 0], sizes = [2, 8, 16], strides = [1, 1, 1]} : vector<2x8x32xf32> to vector<2x8x16xf32>
    %44 = vector.extract_strided_slice %36 {offsets = [0, 0, 16], sizes = [2, 8, 16], strides = [1, 1, 1]} : vector<2x8x32xf32> to vector<2x8x16xf32>
    %45 = tpu.concatenate %43, %44 in 0 : vector<2x8x16xf32>, vector<2x8x16xf32> -> vector<4x8x16xf32>
    %cst_19 = arith.constant dense<0.000000e+00> : vector<4x8x8xf32>
    %46 = tpu.matmul %39, %42, %cst_19 {dimension_numbers = #tpu.dot_dimension_numbers<[2], [2], [1], [1], [0, 0, 0, 1, 1, 1], [0], [0]>} : vector<4x8x16xf32>, vector<4x8x16xf32>, vector<4x8x8xf32> -> vector<4x8x8xf32>
    %cst_20 = arith.constant 2.500000e-01 : f32
    %47 = vector.broadcast %cst_20 : f32 to vector<4x8x8xf32>
    %48 = arith.mulf %46, %47 : vector<4x8x8xf32>
    %49 = vector.broadcast %25 : vector<4x1x8xf32> to vector<4x8x8xf32>
    %50 = arith.addf %48, %49 : vector<4x8x8xf32>
    %cst_21 = arith.constant dense<0xFF800000> : vector<4x8xf32>
    %51 = vector.multi_reduction <maximumf>, %50, %cst_21 [2] : vector<4x8x8xf32> to vector<4x8xf32>
    %52 = vector.shape_cast %51 : vector<4x8xf32> to vector<4x8x1xf32>
    %53 = vector.broadcast %52 : vector<4x8x1xf32> to vector<4x8x8xf32>
    %54 = arith.subf %50, %53 : vector<4x8x8xf32>
    %55 = math.exp %54 : vector<4x8x8xf32>
    %cst_22 = arith.constant dense<0.000000e+00> : vector<4x8xf32>
    %56 = vector.multi_reduction <add>, %55, %cst_22 [2] : vector<4x8x8xf32> to vector<4x8xf32>
    %57 = vector.shape_cast %56 : vector<4x8xf32> to vector<4x8x1xf32>
    %58 = tpu.reciprocal %57 {approx = true} : vector<4x8x1xf32> -> vector<4x8x1xf32>
    %59 = vector.broadcast %58 : vector<4x8x1xf32> to vector<4x8x8xf32>
    %60 = arith.mulf %55, %59 : vector<4x8x8xf32>
    %cst_23 = arith.constant dense<0.000000e+00> : vector<4x8x16xf32>
    %61 = tpu.matmul %60, %45, %cst_23 {dimension_numbers = #tpu.dot_dimension_numbers<[2], [1], [1], [2], [0, 0, 0, 1, 1, 2], [0], [0]>} : vector<4x8x8xf32>, vector<4x8x16xf32>, vector<4x8x16xf32> -> vector<4x8x16xf32>
    %62 = vector.extract_strided_slice %61 {offsets = [0, 0, 0], sizes = [2, 8, 16], strides = [1, 1, 1]} : vector<4x8x16xf32> to vector<2x8x16xf32>
    %63 = vector.extract_strided_slice %61 {offsets = [2, 0, 0], sizes = [2, 8, 16], strides = [1, 1, 1]} : vector<4x8x16xf32> to vector<2x8x16xf32>
    %64 = tpu.concatenate %62, %63 in 2 : vector<2x8x16xf32>, vector<2x8x16xf32> -> vector<2x8x32xf32>
    %65 = vector.shape_cast %64 : vector<2x8x32xf32> to vector<16x32xf32>
    %c0_24 = arith.constant 0 : index
    %c0_25 = arith.constant 0 : index
    %c0_26 = arith.constant 0 : index
    %66 = vector.load %arg6[%c0_24, %c0_25, %c0_26] : memref<2x32x32xf32, #tpu.memory_space<vmem>>, vector<1x32x32xf32>
    %67 = vector.shape_cast %66 : vector<1x32x32xf32> to vector<32x32xf32>
    %cst_27 = arith.constant dense<0.000000e+00> : vector<16x32xf32>
    %68 = tpu.matmul %65, %67, %cst_27 {dimension_numbers = #tpu.dot_dimension_numbers<[1], [0], [0], [1], [0, 0, 1, 1], [], []>} : vector<16x32xf32>, vector<32x32xf32>, vector<16x32xf32> -> vector<16x32xf32>
    %c0_28 = arith.constant 0 : index
    %c0_29 = arith.constant 0 : index
    %c0_30 = arith.constant 0 : index
    %69 = vector.load %arg7[%c0_28, %c0_29, %c0_30] : memref<2x1x32xf32, #tpu.memory_space<vmem>>, vector<1x1x32xf32>
    %70 = vector.shape_cast %69 : vector<1x1x32xf32> to vector<1x32xf32>
    %71 = vector.broadcast %70 : vector<1x32xf32> to vector<16x32xf32>
    %72 = arith.addf %68, %71 : vector<16x32xf32>
    %73 = arith.addf %72, %24 : vector<16x32xf32>
    %c0_31 = arith.constant 0 : index
    %c0_32 = arith.constant 0 : index
    %c0_33 = arith.constant 0 : index
    %74 = vector.load %arg8[%c0_31, %c0_32, %c0_33] : memref<2x1x32xf32, #tpu.memory_space<vmem>>, vector<1x1x32xf32>
    %75 = vector.shape_cast %74 : vector<1x1x32xf32> to vector<1x32xf32>
    %c0_34 = arith.constant 0 : index
    %c0_35 = arith.constant 0 : index
    %c0_36 = arith.constant 0 : index
    %76 = vector.load %arg9[%c0_34, %c0_35, %c0_36] : memref<2x1x32xf32, #tpu.memory_space<vmem>>, vector<1x1x32xf32>
    %77 = vector.shape_cast %76 : vector<1x1x32xf32> to vector<1x32xf32>
    %cst_37 = arith.constant dense<0.000000e+00> : vector<16xf32>
    %78 = vector.multi_reduction <add>, %73, %cst_37 [1] : vector<16x32xf32> to vector<16xf32>
    %79 = vector.shape_cast %78 : vector<16xf32> to vector<16x1xf32>
    %cst_38 = arith.constant 3.200000e+01 : f32
    %80 = vector.broadcast %cst_38 : f32 to vector<16x1xf32>
    %81 = arith.divf %79, %80 : vector<16x1xf32>
    %82 = vector.broadcast %81 : vector<16x1xf32> to vector<16x32xf32>
    %83 = arith.subf %73, %82 : vector<16x32xf32>
    %84 = arith.mulf %83, %83 : vector<16x32xf32>
    %cst_39 = arith.constant dense<0.000000e+00> : vector<16xf32>
    %85 = vector.multi_reduction <add>, %84, %cst_39 [1] : vector<16x32xf32> to vector<16xf32>
    %86 = vector.shape_cast %85 : vector<16xf32> to vector<16x1xf32>
    %cst_40 = arith.constant 3.200000e+01 : f32
    %87 = vector.broadcast %cst_40 : f32 to vector<16x1xf32>
    %88 = arith.divf %86, %87 : vector<16x1xf32>
    %89 = vector.broadcast %81 : vector<16x1xf32> to vector<16x32xf32>
    %90 = arith.subf %73, %89 : vector<16x32xf32>
    %cst_41 = arith.constant 9.99999974E-6 : f32
    %91 = vector.broadcast %cst_41 : f32 to vector<16x1xf32>
    %92 = arith.addf %88, %91 : vector<16x1xf32>
    %93 = math.rsqrt %92 : vector<16x1xf32>
    %94 = vector.broadcast %93 : vector<16x1xf32> to vector<16x32xf32>
    %95 = arith.mulf %90, %94 : vector<16x32xf32>
    %96 = vector.broadcast %75 : vector<1x32xf32> to vector<16x32xf32>
    %97 = arith.mulf %95, %96 : vector<16x32xf32>
    %98 = vector.broadcast %77 : vector<1x32xf32> to vector<16x32xf32>
    %99 = arith.addf %97, %98 : vector<16x32xf32>
    %c0_42 = arith.constant 0 : index
    %c0_43 = arith.constant 0 : index
    %c0_44 = arith.constant 0 : index
    %100 = vector.load %arg10[%c0_42, %c0_43, %c0_44] : memref<2x32x64xf32, #tpu.memory_space<vmem>>, vector<1x32x64xf32>
    %101 = vector.shape_cast %100 : vector<1x32x64xf32> to vector<32x64xf32>
    %cst_45 = arith.constant dense<0.000000e+00> : vector<16x64xf32>
    %102 = tpu.matmul %99, %101, %cst_45 {dimension_numbers = #tpu.dot_dimension_numbers<[1], [0], [0], [1], [0, 0, 1, 1], [], []>} : vector<16x32xf32>, vector<32x64xf32>, vector<16x64xf32> -> vector<16x64xf32>
    %c0_46 = arith.constant 0 : index
    %c0_47 = arith.constant 0 : index
    %c0_48 = arith.constant 0 : index
    %103 = vector.load %arg11[%c0_46, %c0_47, %c0_48] : memref<2x1x64xf32, #tpu.memory_space<vmem>>, vector<1x1x64xf32>
    %104 = vector.shape_cast %103 : vector<1x1x64xf32> to vector<1x64xf32>
    %105 = vector.broadcast %104 : vector<1x64xf32> to vector<16x64xf32>
    %106 = arith.addf %102, %105 : vector<16x64xf32>
    %cst_49 = arith.constant 5.000000e-01 : f32
    %107 = vector.broadcast %cst_49 : f32 to vector<16x64xf32>
    %108 = arith.mulf %107, %106 : vector<16x64xf32>
    %cst_50 = arith.constant 0.707106769 : f32
    %109 = vector.broadcast %cst_50 : f32 to vector<16x64xf32>
    %110 = arith.mulf %106, %109 : vector<16x64xf32>
    %111 = math.erf %110 : vector<16x64xf32>
    %cst_51 = arith.constant 1.000000e+00 : f32
    %112 = vector.broadcast %cst_51 : f32 to vector<16x64xf32>
    %113 = arith.addf %112, %111 : vector<16x64xf32>
    %114 = arith.mulf %108, %113 : vector<16x64xf32>
    %c0_52 = arith.constant 0 : index
    %c0_53 = arith.constant 0 : index
    %c0_54 = arith.constant 0 : index
    %115 = vector.load %arg12[%c0_52, %c0_53, %c0_54] : memref<2x64x32xf32, #tpu.memory_space<vmem>>, vector<1x64x32xf32>
    %116 = vector.shape_cast %115 : vector<1x64x32xf32> to vector<64x32xf32>
    %cst_55 = arith.constant dense<0.000000e+00> : vector<16x32xf32>
    %117 = tpu.matmul %114, %116, %cst_55 {dimension_numbers = #tpu.dot_dimension_numbers<[1], [0], [0], [1], [0, 0, 1, 1], [], []>} : vector<16x64xf32>, vector<64x32xf32>, vector<16x32xf32> -> vector<16x32xf32>
    %c0_56 = arith.constant 0 : index
    %c0_57 = arith.constant 0 : index
    %c0_58 = arith.constant 0 : index
    %118 = vector.load %arg13[%c0_56, %c0_57, %c0_58] : memref<2x1x32xf32, #tpu.memory_space<vmem>>, vector<1x1x32xf32>
    %119 = vector.shape_cast %118 : vector<1x1x32xf32> to vector<1x32xf32>
    %120 = vector.broadcast %119 : vector<1x32xf32> to vector<16x32xf32>
    %121 = arith.addf %117, %120 : vector<16x32xf32>
    %c1 = arith.constant 1 : index
    %c0_59 = arith.constant 0 : index
    %c0_60 = arith.constant 0 : index
    %122 = vector.load %arg4[%c1, %c0_59, %c0_60] : memref<2x32x96xf32, #tpu.memory_space<vmem>>, vector<1x32x96xf32>
    %123 = vector.shape_cast %122 : vector<1x32x96xf32> to vector<32x96xf32>
    %cst_61 = arith.constant dense<0.000000e+00> : vector<16x96xf32>
    %124 = tpu.matmul %121, %123, %cst_61 {dimension_numbers = #tpu.dot_dimension_numbers<[1], [0], [0], [1], [0, 0, 1, 1], [], []>} : vector<16x32xf32>, vector<32x96xf32>, vector<16x96xf32> -> vector<16x96xf32>
    %c1_62 = arith.constant 1 : index
    %c0_63 = arith.constant 0 : index
    %c0_64 = arith.constant 0 : index
    %125 = vector.load %arg5[%c1_62, %c0_63, %c0_64] : memref<2x1x96xf32, #tpu.memory_space<vmem>>, vector<1x1x96xf32>
    %126 = vector.shape_cast %125 : vector<1x1x96xf32> to vector<1x96xf32>
    %127 = vector.broadcast %126 : vector<1x96xf32> to vector<16x96xf32>
    %128 = arith.addf %124, %127 : vector<16x96xf32>
    %129 = vector.shape_cast %128 : vector<16x96xf32> to vector<2x8x96xf32>
    %130 = vector.extract_strided_slice %129 {offsets = [0, 0, 0], sizes = [2, 8, 32], strides = [1, 1, 1]} : vector<2x8x96xf32> to vector<2x8x32xf32>
    %131 = vector.extract_strided_slice %129 {offsets = [0, 0, 32], sizes = [2, 8, 32], strides = [1, 1, 1]} : vector<2x8x96xf32> to vector<2x8x32xf32>
    %132 = vector.extract_strided_slice %129 {offsets = [0, 0, 64], sizes = [2, 8, 32], strides = [1, 1, 1]} : vector<2x8x96xf32> to vector<2x8x32xf32>
    %133 = vector.extract_strided_slice %130 {offsets = [0, 0, 0], sizes = [2, 8, 16], strides = [1, 1, 1]} : vector<2x8x32xf32> to vector<2x8x16xf32>
    %134 = vector.extract_strided_slice %130 {offsets = [0, 0, 16], sizes = [2, 8, 16], strides = [1, 1, 1]} : vector<2x8x32xf32> to vector<2x8x16xf32>
    %135 = tpu.concatenate %133, %134 in 0 : vector<2x8x16xf32>, vector<2x8x16xf32> -> vector<4x8x16xf32>
    %136 = vector.extract_strided_slice %131 {offsets = [0, 0, 0], sizes = [2, 8, 16], strides = [1, 1, 1]} : vector<2x8x32xf32> to vector<2x8x16xf32>
    %137 = vector.extract_strided_slice %131 {offsets = [0, 0, 16], sizes = [2, 8, 16], strides = [1, 1, 1]} : vector<2x8x32xf32> to vector<2x8x16xf32>
    %138 = tpu.concatenate %136, %137 in 0 : vector<2x8x16xf32>, vector<2x8x16xf32> -> vector<4x8x16xf32>
    %139 = vector.extract_strided_slice %132 {offsets = [0, 0, 0], sizes = [2, 8, 16], strides = [1, 1, 1]} : vector<2x8x32xf32> to vector<2x8x16xf32>
    %140 = vector.extract_strided_slice %132 {offsets = [0, 0, 16], sizes = [2, 8, 16], strides = [1, 1, 1]} : vector<2x8x32xf32> to vector<2x8x16xf32>
    %141 = tpu.concatenate %139, %140 in 0 : vector<2x8x16xf32>, vector<2x8x16xf32> -> vector<4x8x16xf32>
    %cst_65 = arith.constant dense<0.000000e+00> : vector<4x8x8xf32>
    %142 = tpu.matmul %135, %138, %cst_65 {dimension_numbers = #tpu.dot_dimension_numbers<[2], [2], [1], [1], [0, 0, 0, 1, 1, 1], [0], [0]>} : vector<4x8x16xf32>, vector<4x8x16xf32>, vector<4x8x8xf32> -> vector<4x8x8xf32>
    %cst_66 = arith.constant 2.500000e-01 : f32
    %143 = vector.broadcast %cst_66 : f32 to vector<4x8x8xf32>
    %144 = arith.mulf %142, %143 : vector<4x8x8xf32>
    %145 = vector.broadcast %25 : vector<4x1x8xf32> to vector<4x8x8xf32>
    %146 = arith.addf %144, %145 : vector<4x8x8xf32>
    %cst_67 = arith.constant dense<0xFF800000> : vector<4x8xf32>
    %147 = vector.multi_reduction <maximumf>, %146, %cst_67 [2] : vector<4x8x8xf32> to vector<4x8xf32>
    %148 = vector.shape_cast %147 : vector<4x8xf32> to vector<4x8x1xf32>
    %149 = vector.broadcast %148 : vector<4x8x1xf32> to vector<4x8x8xf32>
    %150 = arith.subf %146, %149 : vector<4x8x8xf32>
    %151 = math.exp %150 : vector<4x8x8xf32>
    %cst_68 = arith.constant dense<0.000000e+00> : vector<4x8xf32>
    %152 = vector.multi_reduction <add>, %151, %cst_68 [2] : vector<4x8x8xf32> to vector<4x8xf32>
    %153 = vector.shape_cast %152 : vector<4x8xf32> to vector<4x8x1xf32>
    %154 = tpu.reciprocal %153 {approx = true} : vector<4x8x1xf32> -> vector<4x8x1xf32>
    %155 = vector.broadcast %154 : vector<4x8x1xf32> to vector<4x8x8xf32>
    %156 = arith.mulf %151, %155 : vector<4x8x8xf32>
    %cst_69 = arith.constant dense<0.000000e+00> : vector<4x8x16xf32>
    %157 = tpu.matmul %156, %141, %cst_69 {dimension_numbers = #tpu.dot_dimension_numbers<[2], [1], [1], [2], [0, 0, 0, 1, 1, 2], [0], [0]>} : vector<4x8x8xf32>, vector<4x8x16xf32>, vector<4x8x16xf32> -> vector<4x8x16xf32>
    %158 = vector.extract_strided_slice %157 {offsets = [0, 0, 0], sizes = [2, 8, 16], strides = [1, 1, 1]} : vector<4x8x16xf32> to vector<2x8x16xf32>
    %159 = vector.extract_strided_slice %157 {offsets = [2, 0, 0], sizes = [2, 8, 16], strides = [1, 1, 1]} : vector<4x8x16xf32> to vector<2x8x16xf32>
    %160 = tpu.concatenate %158, %159 in 2 : vector<2x8x16xf32>, vector<2x8x16xf32> -> vector<2x8x32xf32>
    %161 = vector.shape_cast %160 : vector<2x8x32xf32> to vector<16x32xf32>
    %c1_70 = arith.constant 1 : index
    %c0_71 = arith.constant 0 : index
    %c0_72 = arith.constant 0 : index
    %162 = vector.load %arg6[%c1_70, %c0_71, %c0_72] : memref<2x32x32xf32, #tpu.memory_space<vmem>>, vector<1x32x32xf32>
    %163 = vector.shape_cast %162 : vector<1x32x32xf32> to vector<32x32xf32>
    %cst_73 = arith.constant dense<0.000000e+00> : vector<16x32xf32>
    %164 = tpu.matmul %161, %163, %cst_73 {dimension_numbers = #tpu.dot_dimension_numbers<[1], [0], [0], [1], [0, 0, 1, 1], [], []>} : vector<16x32xf32>, vector<32x32xf32>, vector<16x32xf32> -> vector<16x32xf32>
    %c1_74 = arith.constant 1 : index
    %c0_75 = arith.constant 0 : index
    %c0_76 = arith.constant 0 : index
    %165 = vector.load %arg7[%c1_74, %c0_75, %c0_76] : memref<2x1x32xf32, #tpu.memory_space<vmem>>, vector<1x1x32xf32>
    %166 = vector.shape_cast %165 : vector<1x1x32xf32> to vector<1x32xf32>
    %167 = vector.broadcast %166 : vector<1x32xf32> to vector<16x32xf32>
    %168 = arith.addf %164, %167 : vector<16x32xf32>
    %169 = arith.addf %168, %121 : vector<16x32xf32>
    %c1_77 = arith.constant 1 : index
    %c0_78 = arith.constant 0 : index
    %c0_79 = arith.constant 0 : index
    %170 = vector.load %arg8[%c1_77, %c0_78, %c0_79] : memref<2x1x32xf32, #tpu.memory_space<vmem>>, vector<1x1x32xf32>
    %171 = vector.shape_cast %170 : vector<1x1x32xf32> to vector<1x32xf32>
    %c1_80 = arith.constant 1 : index
    %c0_81 = arith.constant 0 : index
    %c0_82 = arith.constant 0 : index
    %172 = vector.load %arg9[%c1_80, %c0_81, %c0_82] : memref<2x1x32xf32, #tpu.memory_space<vmem>>, vector<1x1x32xf32>
    %173 = vector.shape_cast %172 : vector<1x1x32xf32> to vector<1x32xf32>
    %cst_83 = arith.constant dense<0.000000e+00> : vector<16xf32>
    %174 = vector.multi_reduction <add>, %169, %cst_83 [1] : vector<16x32xf32> to vector<16xf32>
    %175 = vector.shape_cast %174 : vector<16xf32> to vector<16x1xf32>
    %cst_84 = arith.constant 3.200000e+01 : f32
    %176 = vector.broadcast %cst_84 : f32 to vector<16x1xf32>
    %177 = arith.divf %175, %176 : vector<16x1xf32>
    %178 = vector.broadcast %177 : vector<16x1xf32> to vector<16x32xf32>
    %179 = arith.subf %169, %178 : vector<16x32xf32>
    %180 = arith.mulf %179, %179 : vector<16x32xf32>
    %cst_85 = arith.constant dense<0.000000e+00> : vector<16xf32>
    %181 = vector.multi_reduction <add>, %180, %cst_85 [1] : vector<16x32xf32> to vector<16xf32>
    %182 = vector.shape_cast %181 : vector<16xf32> to vector<16x1xf32>
    %cst_86 = arith.constant 3.200000e+01 : f32
    %183 = vector.broadcast %cst_86 : f32 to vector<16x1xf32>
    %184 = arith.divf %182, %183 : vector<16x1xf32>
    %185 = vector.broadcast %177 : vector<16x1xf32> to vector<16x32xf32>
    %186 = arith.subf %169, %185 : vector<16x32xf32>
    %cst_87 = arith.constant 9.99999974E-6 : f32
    %187 = vector.broadcast %cst_87 : f32 to vector<16x1xf32>
    %188 = arith.addf %184, %187 : vector<16x1xf32>
    %189 = math.rsqrt %188 : vector<16x1xf32>
    %190 = vector.broadcast %189 : vector<16x1xf32> to vector<16x32xf32>
    %191 = arith.mulf %186, %190 : vector<16x32xf32>
    %192 = vector.broadcast %171 : vector<1x32xf32> to vector<16x32xf32>
    %193 = arith.mulf %191, %192 : vector<16x32xf32>
    %194 = vector.broadcast %173 : vector<1x32xf32> to vector<16x32xf32>
    %195 = arith.addf %193, %194 : vector<16x32xf32>
    %c1_88 = arith.constant 1 : index
    %c0_89 = arith.constant 0 : index
    %c0_90 = arith.constant 0 : index
    %196 = vector.load %arg10[%c1_88, %c0_89, %c0_90] : memref<2x32x64xf32, #tpu.memory_space<vmem>>, vector<1x32x64xf32>
    %197 = vector.shape_cast %196 : vector<1x32x64xf32> to vector<32x64xf32>
    %cst_91 = arith.constant dense<0.000000e+00> : vector<16x64xf32>
    %198 = tpu.matmul %195, %197, %cst_91 {dimension_numbers = #tpu.dot_dimension_numbers<[1], [0], [0], [1], [0, 0, 1, 1], [], []>} : vector<16x32xf32>, vector<32x64xf32>, vector<16x64xf32> -> vector<16x64xf32>
    %c1_92 = arith.constant 1 : index
    %c0_93 = arith.constant 0 : index
    %c0_94 = arith.constant 0 : index
    %199 = vector.load %arg11[%c1_92, %c0_93, %c0_94] : memref<2x1x64xf32, #tpu.memory_space<vmem>>, vector<1x1x64xf32>
    %200 = vector.shape_cast %199 : vector<1x1x64xf32> to vector<1x64xf32>
    %201 = vector.broadcast %200 : vector<1x64xf32> to vector<16x64xf32>
    %202 = arith.addf %198, %201 : vector<16x64xf32>
    %cst_95 = arith.constant 5.000000e-01 : f32
    %203 = vector.broadcast %cst_95 : f32 to vector<16x64xf32>
    %204 = arith.mulf %203, %202 : vector<16x64xf32>
    %cst_96 = arith.constant 0.707106769 : f32
    %205 = vector.broadcast %cst_96 : f32 to vector<16x64xf32>
    %206 = arith.mulf %202, %205 : vector<16x64xf32>
    %207 = math.erf %206 : vector<16x64xf32>
    %cst_97 = arith.constant 1.000000e+00 : f32
    %208 = vector.broadcast %cst_97 : f32 to vector<16x64xf32>
    %209 = arith.addf %208, %207 : vector<16x64xf32>
    %210 = arith.mulf %204, %209 : vector<16x64xf32>
    %c1_98 = arith.constant 1 : index
    %c0_99 = arith.constant 0 : index
    %c0_100 = arith.constant 0 : index
    %211 = vector.load %arg12[%c1_98, %c0_99, %c0_100] : memref<2x64x32xf32, #tpu.memory_space<vmem>>, vector<1x64x32xf32>
    %212 = vector.shape_cast %211 : vector<1x64x32xf32> to vector<64x32xf32>
    %cst_101 = arith.constant dense<0.000000e+00> : vector<16x32xf32>
    %213 = tpu.matmul %210, %212, %cst_101 {dimension_numbers = #tpu.dot_dimension_numbers<[1], [0], [0], [1], [0, 0, 1, 1], [], []>} : vector<16x64xf32>, vector<64x32xf32>, vector<16x32xf32> -> vector<16x32xf32>
    %c1_102 = arith.constant 1 : index
    %c0_103 = arith.constant 0 : index
    %c0_104 = arith.constant 0 : index
    %214 = vector.load %arg13[%c1_102, %c0_103, %c0_104] : memref<2x1x32xf32, #tpu.memory_space<vmem>>, vector<1x1x32xf32>
    %215 = vector.shape_cast %214 : vector<1x1x32xf32> to vector<1x32xf32>
    %216 = vector.broadcast %215 : vector<1x32xf32> to vector<16x32xf32>
    %217 = arith.addf %213, %216 : vector<16x32xf32>
    %c0_105 = arith.constant 0 : index
    %c0_106 = arith.constant 0 : index
    %218 = vector.load %arg14[%c0_105, %c0_106] : memref<32x32xf32, #tpu.memory_space<vmem>>, vector<32x32xf32>
    %cst_107 = arith.constant dense<0.000000e+00> : vector<16x32xf32>
    %219 = tpu.matmul %217, %218, %cst_107 {dimension_numbers = #tpu.dot_dimension_numbers<[1], [0], [0], [1], [0, 0, 1, 1], [], []>} : vector<16x32xf32>, vector<32x32xf32>, vector<16x32xf32> -> vector<16x32xf32>
    %c0_108 = arith.constant 0 : index
    %c0_109 = arith.constant 0 : index
    %220 = vector.load %arg15[%c0_108, %c0_109] : memref<1x32xf32, #tpu.memory_space<vmem>>, vector<1x32xf32>
    %221 = vector.broadcast %220 : vector<1x32xf32> to vector<16x32xf32>
    %222 = arith.addf %219, %221 : vector<16x32xf32>
    %cst_110 = arith.constant 5.000000e-01 : f32
    %223 = vector.broadcast %cst_110 : f32 to vector<16x32xf32>
    %224 = arith.mulf %223, %222 : vector<16x32xf32>
    %cst_111 = arith.constant 0.707106769 : f32
    %225 = vector.broadcast %cst_111 : f32 to vector<16x32xf32>
    %226 = arith.mulf %222, %225 : vector<16x32xf32>
    %227 = math.erf %226 : vector<16x32xf32>
    %cst_112 = arith.constant 1.000000e+00 : f32
    %228 = vector.broadcast %cst_112 : f32 to vector<16x32xf32>
    %229 = arith.addf %228, %227 : vector<16x32xf32>
    %230 = arith.mulf %224, %229 : vector<16x32xf32>
    %c0_113 = arith.constant 0 : index
    %c0_114 = arith.constant 0 : index
    %231 = vector.load %arg16[%c0_113, %c0_114] : memref<32x128xf32, #tpu.memory_space<vmem>>, vector<32x128xf32>
    %cst_115 = arith.constant dense<0.000000e+00> : vector<16x128xf32>
    %232 = tpu.matmul %230, %231, %cst_115 {dimension_numbers = #tpu.dot_dimension_numbers<[1], [0], [0], [1], [0, 0, 1, 1], [], []>} : vector<16x32xf32>, vector<32x128xf32>, vector<16x128xf32> -> vector<16x128xf32>
    %c0_116 = arith.constant 0 : index
    %c0_117 = arith.constant 0 : index
    %233 = vector.load %arg21[%c0_116, %c0_117] : memref<16x128xf32, #tpu.memory_space<vmem>>, vector<16x128xf32>
    tpu.vector_store %arg21[%c0_116, %c0_117], %232 {strides = array<i32>} : memref<16x128xf32, #tpu.memory_space<vmem>>, vector<16x128xf32>,
    %234 = vector.extract_strided_slice %217 {offsets = [0, 0], sizes = [1, 32], strides = [1, 1]} : vector<16x32xf32> to vector<1x32xf32>
    %235 = vector.extract_strided_slice %217 {offsets = [8, 0], sizes = [1, 32], strides = [1, 1]} : vector<16x32xf32> to vector<1x32xf32>
    %236 = tpu.concatenate %234, %235 in 0 : vector<1x32xf32>, vector<1x32xf32> -> vector<2x32xf32>
    %c0_118 = arith.constant 0 : index
    %c0_119 = arith.constant 0 : index
    %237 = vector.load %arg17[%c0_118, %c0_119] : memref<32x32xf32, #tpu.memory_space<vmem>>, vector<32x32xf32>
    %cst_120 = arith.constant dense<0.000000e+00> : vector<2x32xf32>
    %238 = tpu.matmul %236, %237, %cst_120 {dimension_numbers = #tpu.dot_dimension_numbers<[1], [0], [0], [1], [0, 0, 1, 1], [], []>} : vector<2x32xf32>, vector<32x32xf32>, vector<2x32xf32> -> vector<2x32xf32>
    %c0_121 = arith.constant 0 : index
    %c0_122 = arith.constant 0 : index
    %239 = vector.load %arg18[%c0_121, %c0_122] : memref<1x32xf32, #tpu.memory_space<vmem>>, vector<1x32xf32>
    %240 = vector.broadcast %239 : vector<1x32xf32> to vector<2x32xf32>
    %241 = arith.addf %238, %240 : vector<2x32xf32>
    %242 = math.tanh %241 : vector<2x32xf32>
    %c0_123 = arith.constant 0 : index
    %c0_124 = arith.constant 0 : index
    %243 = vector.load %arg19[%c0_123, %c0_124] : memref<32x128xf32, #tpu.memory_space<vmem>>, vector<32x128xf32>
    %cst_125 = arith.constant dense<0.000000e+00> : vector<2x128xf32>
    %244 = tpu.matmul %242, %243, %cst_125 {dimension_numbers = #tpu.dot_dimension_numbers<[1], [0], [0], [1], [0, 0, 1, 1], [], []>} : vector<2x32xf32>, vector<32x128xf32>, vector<2x128xf32> -> vector<2x128xf32>
    %c0_126 = arith.constant 0 : index
    %c0_127 = arith.constant 0 : index
    %245 = vector.load %arg20[%c0_126, %c0_127] : memref<1x128xf32, #tpu.memory_space<vmem>>, vector<1x128xf32>
    %246 = vector.broadcast %245 : vector<1x128xf32> to vector<2x128xf32>
    %247 = arith.addf %244, %246 : vector<2x128xf32>
    %c0_128 = arith.constant 0 : index
    %c0_129 = arith.constant 0 : index
    %248 = vector.load %arg22[%c0_128, %c0_129] : memref<2x128xf32, #tpu.memory_space<vmem>>, vector<2x128xf32>
    tpu.vector_store %arg22[%c0_128, %c0_129], %247 {strides = array<i32>} : memref<2x128xf32, #tpu.memory_space<vmem>>, vector<2x128xf32>,
    return
  }
}

</mosaic_0001>

<bundles_post_ra>
// kernel: seqbert_forward.1
= control target key start
LH: loop header
LB: loop body
LE: loop exit
PB: predicated region body
PF: predicated region fallthrough
CT: control target
= control target key end

     0   :  { %s2359_s0 = inlined_call_operand.vmem [shape: f32[16,32], index: 0, kind: input, shape index: {}]   ;;  %s2360_s1 = inlined_call_operand.vmem [shape: f32[4,1,8], index: 1, kind: input, shape index: {}]   ;;  %s2361_s2 = inlined_call_operand.vmem [shape: f32[1,32], index: 2, kind: input, shape index: {}]   ;;  %s2362_s3 = inlined_call_operand.vmem [shape: f32[1,32], index: 3, kind: input, shape index: {}]   ;;  %s2363_s4 = inlined_call_operand.vmem [shape: f32[2,32,96], index: 4, kind: input, shape index: {}]   ;;  %s2364_s5 = inlined_call_operand.vmem [shape: f32[2,1,96], index: 5, kind: input, shape index: {}]   ;;  %s2365_s6 = inlined_call_operand.vmem [shape: f32[2,32,32], index: 6, kind: input, shape index: {}]   ;;  %s2366_s7 = inlined_call_operand.vmem [shape: f32[2,1,32], index: 7, kind: input, shape index: {}]   ;;  %s2367_s8 = inlined_call_operand.vmem [shape: f32[2,1,32], index: 8, kind: input, shape index: {}]   ;;  %s2368_s9 = inlined_call_operand.vmem [shape: f32[2,1,32], index: 9, kind: input, shape index: {}]   ;;  %s2369_s10 = inlined_call_operand.vmem [shape: f32[2,32,64], index: 10, kind: input, shape index: {}]   ;;  %s2370_s11 = inlined_call_operand.vmem [shape: f32[2,1,64], index: 11, kind: input, shape index: {}]   ;;  %s2371_s12 = inlined_call_operand.vmem [shape: f32[2,64,32], index: 12, kind: input, shape index: {}]   ;;  %s2372_s13 = inlined_call_operand.vmem [shape: f32[2,1,32], index: 13, kind: input, shape index: {}]   ;;  %s2373_s14 = inlined_call_operand.vmem [shape: f32[32,32], index: 14, kind: input, shape index: {}]   ;;  %s2374_s15 = inlined_call_operand.vmem [shape: f32[1,32], index: 15, kind: input, shape index: {}]   ;;  %s2375_s16 = inlined_call_operand.vmem [shape: f32[32,128], index: 16, kind: input, shape index: {}]   ;;  %s2376_s17 = inlined_call_operand.vmem [shape: f32[32,32], index: 17, kind: input, shape index: {}]   ;;  %s2377_s18 = inlined_call_operand.vmem [shape: f32[1,32], index: 18, kind: input, shape index: {}]   ;;  %s2378_s19 = inlined_call_operand.vmem [shape: f32[32,128], index: 19, kind: input, shape index: {}]   ;;  %s2379_s20 = inlined_call_operand.vmem [shape: f32[1,128], index: 20, kind: input, shape index: {}]   ;;  %s2380_s21 = inlined_call_operand.vmem [shape: f32[16,128], index: 21, kind: output, shape index: {0}]   ;;  %s2381_s22 = inlined_call_operand.hbm [shape: f32[2,128], index: 22, kind: output, shape index: {1}]  }
   0x1   :  { %2387 = sst [smem:[#allocation5_spill]] %s2359_s0 }
   0x2   :  { %2388 = sst [smem:[#allocation6_spill]] %s2360_s1 }
   0x3   :  { %2389 = sst [smem:[#allocation7_spill]] %s2361_s2 }
   0x4   :  { %2390 = sst [smem:[#allocation8_spill]] %s2362_s3 }
   0x5   :  { %2391 = sst [smem:[#allocation9_spill]] %s2363_s4 }
   0x6   :  { %2392 = sst [smem:[#allocation10_spill]] %s2364_s5 }
   0x7   :  { %2393 = sst [smem:[#allocation11_spill]] %s2365_s6 }
   0x8   :  { %s2394_s29 = sld [smem:[#allocation5_spill]]  ;;  %vm75_vm0 = vcmask 261120  }
   0xe   :  { %v71_v0 = vld [vmem:[%s2394_s29] sm:$0xff]  ;;  %v72_v1 = vld [vmem:[%s2394_s29 + $0x8] sm:$0xff] }
   0xf   :  { %v76_v2 = vsel %vm75_vm0, %v71_v0, 0.0  ;;  %v79_v3 = vsel %vm75_vm0, %v72_v1, 0.0 }
  0x10   :  { %77 = vadd.xlane.f32.xlu0 %v76_v2 }
  0x11   :  { %28 = vsyncpa [#allocation3], 0  ;;  %v1758_v4 = vmov 32.0   ;;  %s2395_s1 = sld [smem:[#allocation9_spill]]  ;;  %s1759_s24 = smov 96   ;;  %vm186_vm8 = vcmask 130048  }
  0x12   :  { %1672 = vrcp.f32 %v1758_v4  ;;  %s2396_s28 = sld [smem:[#allocation7_spill]]  ;;  %s1760_s6 = smov 112   ;;  %vm309_vm9 = vcmask 64512  }
  0x13   :  { %s2397_s4 = sld [smem:[#allocation8_spill]]  ;;  %s1761_s0 = smov 64  }
  0x14   :  { %s2398_s5 = sld [smem:[#allocation10_spill]]  ;;  %s1762_s23 = smov 16  }
  0x15   :  { %s2399_s2 = sld [smem:[#allocation6_spill]] }
  0x17   :  { %v144_v21 = vld [vmem:[%s2395_s1 + $0x18] sm:$0xff]  ;;  %v143_v22 = vld [vmem:[%s2395_s1 + $0x10] sm:$0xff]  ;;  %v142_v23 = vld [vmem:[%s2395_s1 + $0x8] sm:$0xff] }
  0x18   :  { %80 = vadd.xlane.f32.xlu0 %v79_v3  ;;  %v1673_v5 = vpop.eup %1672  ;;  %167 = vmatpush.msra.mxu0 %v144_v21  ;;  %v141_v24 = vld [vmem:[%s2395_s1] sm:$0xff] }
  0x19   :  { %v83_v6 = vmul.f32 32.0, %v1673_v5  ;;  %vm87_vm1 = vweird.f32 %v1673_v5  ;;  %v1651_v39 = vld [vmem:[%s2396_s28] ss:$0 sm:$0xff] }
  0x1a   :  { %168 = vmatpush.msra.mxu0 %v143_v22  ;;  %v1652_v43 = vld [vmem:[%s2397_s4] ss:$0 sm:$0xff] }
  0x1b   :  { %v84_v7 = vsub.f32 1.0, %v83_v6  ;;  %v1653_v53 = vld [vmem:[%s2398_s5] ss:$0 sm:$0xff] }
  0x1c   :  { %169 = vmatpush.msra.mxu0 %v142_v23 }
  0x1d   :  { %v85_v8 = vmul.f32 %v1673_v5, %v84_v7 }
  0x1e   :  { %170 = vmatpush.msra.mxu0 %v141_v24 }
  0x1f   :  { %v86_v9 = vadd.f32 %v1673_v5, %v85_v8 }
  0x21   :  { %v1887_v10 = vsel %vm87_vm1, %v1673_v5, %v86_v9  ;;  %v1961_v5 = vld [vmem:[%s2399_s2 + $0x3] ss:$0 sm:$0xff] }
  0x83   :  { %v78_v11 = vpop.xlane.xlu0 %77 }
  0x84   :  { %v89_v12 = vmul.f32 %v1887_v10, %v78_v11  ;;  %v1968_v11 = vld [vmem:[%s2399_s2 + $0x1] ss:$0 sm:$0xff] }
  0x86   :  { %v91_v13 = vsub.f32 %v71_v0, %v89_v12  ;;  %v1954_v0 = vld [vmem:[%s2399_s2] ss:$0 sm:$0xff] }
  0x88   :  { %v93_v14 = vmul.f32 %v91_v13, %v91_v13 }
  0x8a   :  { %v95_v15 = vsel %vm75_vm0, %v93_v14, 0.0 }
  0x8b   :  { %96 = vadd.xlane.f32.xlu1 %v95_v15  ;;  %v81_v16 = vpop.xlane.xlu0 %80 }
  0x8c   :  { %v90_v17 = vmul.f32 %v1887_v10, %v81_v16  ;;  %v1975_v16 = vld [vmem:[%s2399_s2 + $0x2] ss:$0 sm:$0xff]  ;;  %s2400_s2 = sld [smem:[#allocation11_spill]] }
  0x8e   :  { %v92_v18 = vsub.f32 %v72_v1, %v90_v17 }
  0x90   :  { %v94_v19 = vmul.f32 %v92_v18, %v92_v18 }
  0x92   :  { %v98_v20 = vsel %vm75_vm0, %v94_v19, 0.0 }
  0x93   :  { %99 = vadd.xlane.f32.xlu1 %v98_v20 }
  0xfe   :  { %v97_v25 = vpop.xlane.xlu1 %96 }
  0xff   :  { %v101_v26 = vmul.f32 %v97_v25, %v1887_v10 }
 0x101   :  { %v103_v27 = vadd.f32 1e-05, %v101_v26 }
 0x103   :  { %1674 = vrsqrt.f32 %v103_v27  ;;  %vm111_vm3 = vweird.f32 %v103_v27 }
 0x106   :  { %v100_v28 = vpop.xlane.xlu1 %99 }
 0x107   :  { %v102_v29 = vmul.f32 %v100_v28, %v1887_v10 }
 0x109   :  { %v1675_v30 = vpop.eup %1674  ;;  %v104_v31 = vadd.f32 1e-05, %v102_v29 }
 0x10a   :  { %v106_v32 = vmul.f32 %v1675_v30, %v103_v27  ;;  %vm112_vm2 = vweird.f32 %v1675_v30 }
 0x10b   :  { %1676 = vrsqrt.f32 %v104_v31  ;;  %vm113_vm4 = vmor %vm111_vm3, %vm112_vm2  ;;  %vm121_vm5 = vweird.f32 %v104_v31 }
 0x10c   :  { %v107_v33 = vmul.f32 %v1675_v30, %v106_v32 }
 0x10e   :  { %v108_v34 = vmul.f32 0.5, %v107_v33 }
 0x110   :  { %v109_v35 = vsub.f32 1.5, %v108_v34 }
 0x111   :  { %v1677_v36 = vpop.eup %1676 }
 0x112   :  { %v110_v37 = vmul.f32 %v1675_v30, %v109_v35  ;;  %v116_v38 = vmul.f32 %v1677_v36, %v104_v31  ;;  %vm122_vm6 = vweird.f32 %v1677_v36 }
 0x113   :  { %vm123_vm7 = vmor %vm121_vm5, %vm122_vm6 }
 0x114   :  { %v114_v40 = vsel %vm113_vm4, %v1675_v30, %v110_v37  ;;  %v117_v41 = vmul.f32 %v1677_v36, %v116_v38 }
 0x115   :  { %v125_v42 = vmul.f32 %v114_v40, %v91_v13 }
 0x116   :  { %v118_v44 = vmul.f32 0.5, %v117_v41 }
 0x117   :  { %v130_v45 = vmul.f32 %v1651_v39, %v125_v42 }
 0x118   :  { %v119_v46 = vsub.f32 1.5, %v118_v44 }
 0x119   :  { %v1913_v47 = vadd.f32 %v1652_v43, %v130_v45 }
 0x11a   :  { %v120_v48 = vmul.f32 %v1677_v36, %v119_v46 }
 0x11b   :  { %1562 = vmatmul.msk.f32.vlgmr.msra.gmra.mxu0 %vm75_vm0, %v1913_v47 }
 0x11c   :  { %v124_v49 = vsel %vm123_vm7, %v1677_v36, %v120_v48  ;;  %vm700_vm7 = vcmask 523264  }
 0x11d   :  { %v126_v50 = vmul.f32 %v124_v49, %v92_v18 }
 0x11f   :  { %v131_v51 = vmul.f32 %v1651_v39, %v126_v50 }
 0x121   :  { %v1917_v52 = vadd.f32 %v1652_v43, %v131_v51 }
 0x123   :  { %1563 = vmatmul.msk.f32.gmra.mxu0 %vm75_vm0, %v1917_v52 }
 0x198   :  { %v172_v54 = vpop.f32.mrf.mxu0 }
 0x199   :  { %v173_v55 = vadd.f32 %v1653_v53, %v172_v54 }
 0x19b   :  { %184 = vrot.lane.b32.xlu0 %v173_v55, %s1759_s24  ;;  %180 = vrot.lane.b32.xlu2 %v173_v55, %s1760_s6 }
 0x1a0   :  { %v175_v56 = vpop.f32.mrf.mxu0 }
 0x1a1   :  { %v1926_v57 = vadd.f32 %v1653_v53, %v175_v56 }
 0x1a3   :  { %182 = vrot.lane.b32.xlu2 %v1926_v57, %s1760_s6 }
 0x1f5   :  { %v1930_v58 = vpop.permute.xlu2 %180 }
 0x1f6   :  { %237 = vrot.lane.b32.xlu1 %v1930_v58, %s1759_s24 }
 0x1fd   :  { %v1934_v59 = vpop.permute.xlu2 %182 }
 0x1fe   :  { %263 = vrot.lane.b32.xlu2 %v1934_v59, %s1759_s24  ;;  %v1646_v41 = vpack.i.bf16 %v1934_v59, %v1930_v58 }
 0x206   :  { %211 = vrot.lane.b32.xlu2 %v1926_v57, %s1759_s24 }
 0x20d   :  { %v185_v60 = vpop.permute.xlu0 %184 }
 0x20e   :  { %1564 = vmatpush.xpose.msk.msra.mxu1 %vm186_vm8, %v185_v60 }
 0x211   :  { %1565 = vmatmul.msk.f32.vlgmr.msra.gmra.mxu1 %vm186_vm8, %v173_v55 }
 0x258   :  { %v264_v61 = vpop.permute.xlu2 %263 }
 0x259   :  { %1570 = vmatpush.xpose.msk.msrb.mxu1 %vm186_vm8, %v264_v61 }
 0x25c   :  { %1571 = vmatmul.msk.f32.vlgmr.msrb.gmra.mxu1 %vm186_vm8, %v1934_v59 }
 0x260   :  { %v212_v62 = vpop.permute.xlu2 %211 }
 0x261   :  { %1566 = vmatpush.xpose.msk.msra.mxu2 %vm186_vm8, %v212_v62 }
 0x264   :  { %1567 = vmatmul.msk.f32.vlgmr.msra.gmra.mxu2 %vm186_vm8, %v1926_v57 }
 0x268   :  { %v238_v63 = vpop.permute.xlu1 %237 }
 0x269   :  { %1568 = vmatpush.xpose.msk.msra.mxu3 %vm186_vm8, %v238_v63 }
 0x26c   :  { %1569 = vmatmul.msk.f32.vlgmr.msra.gmra.mxu3 %vm186_vm8, %v1930_v58 }
 0x28e   :  { %v208_v1 = vpop.f32.mrf.mxu1 }
 0x28f   :  { %v289_v2 = vmul.f32 0.25, %v208_v1  ;;  %v471_v1 = vld [vmem:[%s2400_s2 + $0x18] sm:$0xff] }
 0x291   :  { %v305_v3 = vadd.f32 %v1954_v0, %v289_v2  ;;  %v470_v2 = vld [vmem:[%s2400_s2 + $0x10] sm:$0xff] }
 0x293   :  { %v310_v4 = vsel %vm309_vm9, %v305_v3, -inf }
 0x294   :  { %311 = vmax.xlane.f32.xlu2 %v310_v4  ;;  %v468_v4 = vld [vmem:[%s2400_s2] sm:$0xff] }
 0x2d9   :  { %v286_v6 = vpop.f32.mrf.mxu1 }
 0x2da   :  { %v292_v7 = vmul.f32 0.25, %v286_v6 }
 0x2dc   :  { %v308_v8 = vadd.f32 %v1961_v5, %v292_v7 }
 0x2de   :  { %v319_v9 = vsel %vm309_vm9, %v308_v8, -inf }
 0x2df   :  { %320 = vmax.xlane.f32.xlu1 %v319_v9 }
 0x2e7   :  { %v234_v12 = vpop.f32.mrf.mxu2 }
 0x2e8   :  { %v290_v13 = vmul.f32 0.25, %v234_v12 }
 0x2ea   :  { %v306_v14 = vadd.f32 %v1968_v11, %v290_v13  ;;  %v1658_v13 = vld [vmem:[%s2366_s7] ss:$0 sm:$0xff] }
 0x2ec   :  { %v313_v15 = vsel %vm309_vm9, %v306_v14, -inf }
 0x2ed   :  { %314 = vmax.xlane.f32.xlu2 %v313_v15 }
 0x2ef   :  { %v260_v17 = vpop.f32.mrf.mxu3 }
 0x2f0   :  { %v291_v18 = vmul.f32 0.25, %v260_v17 }
 0x2f2   :  { %v307_v19 = vadd.f32 %v1975_v16, %v291_v18 }
 0x2f4   :  { %v316_v20 = vsel %vm309_vm9, %v307_v19, -inf }
 0x2f5   :  { %317 = vmax.xlane.f32.xlu0 %v316_v20 }
 0x307   :  { %v312_v21 = vpop.xlane.xlu2 %311 }
 0x308   :  { %v322_v22 = vsub.f32 %v305_v3, %v312_v21  ;;  %v469_v3 = vld [vmem:[%s2400_s2 + $0x8] sm:$0xff] }
 0x30a   :  { %v326_v23 = vmul.f32 1.442695, %v322_v22 }
 0x30c   :  { %1678 = vpow2.f32 %v326_v23 }
 0x312   :  { %v1679_v24 = vpop.eup %1678 }
 0x313   :  { %v334_v25 = vsel %vm309_vm9, %v1679_v24, 0.0 }
 0x314   :  { %335 = vadd.xlane.f32.xlu0 %v334_v25 }
 0x328   :  { %354 = vrot.lane.b32.xlu0 %v173_v55, %s1761_s0 }
 0x352   :  { %v321_v26 = vpop.xlane.xlu1 %320 }
 0x353   :  { %v325_v27 = vsub.f32 %v308_v8, %v321_v26 }
 0x355   :  { %v332_v28 = vmul.f32 1.442695, %v325_v27 }
 0x357   :  { %1680 = vpow2.f32 %v332_v28 }
 0x35d   :  { %v1681_v29 = vpop.eup %1680 }
 0x35e   :  { %v343_v30 = vsel %vm309_vm9, %v1681_v29, 0.0 }
 0x35f   :  { %344 = vadd.xlane.f32.xlu1 %v343_v30 }
 0x360   :  { %v315_v31 = vpop.xlane.xlu2 %314 }
 0x361   :  { %v323_v32 = vsub.f32 %v306_v14, %v315_v31 }
 0x363   :  { %v328_v33 = vmul.f32 1.442695, %v323_v32  ;;  %v565_v32 = vld [vmem:[%s2369_s10 + $0x10] sm:$0xff] }
 0x365   :  { %1682 = vpow2.f32 %v328_v33  ;;  %v564_v33 = vld [vmem:[%s2369_s10 + $0x8] sm:$0xff] }
 0x368   :  { %v318_v34 = vpop.xlane.xlu0 %317 }
 0x369   :  { %v324_v35 = vsub.f32 %v307_v19, %v318_v34  ;;  %v563_v34 = vld [vmem:[%s2369_s10] sm:$0xff] }
 0x36b   :  { %v1683_v36 = vpop.eup %1682  ;;  %v330_v37 = vmul.f32 1.442695, %v324_v35 }
 0x36c   :  { %v337_v38 = vsel %vm309_vm9, %v1683_v36, 0.0 }
 0x36d   :  { %1684 = vpow2.f32 %v330_v37  ;;  %338 = vadd.xlane.f32.xlu1 %v337_v38 }
 0x373   :  { %v1685_v39 = vpop.eup %1684 }
 0x374   :  { %v340_v40 = vsel %vm309_vm9, %v1685_v39, 0.0 }
 0x375   :  { %341 = vadd.xlane.f32.xlu2 %v340_v40 }
 0x386   :  { %380 = vrot.lane.b32.xlu1 %v1926_v57, %s1761_s0 }
 0x387   :  { %v336_v42 = vpop.xlane.xlu0 %335 }
 0x388   :  { %1686 = vrcp.f32 %v336_v42 }
 0x38d   :  { %1647 = vrot.lane.b32.xlu2 %v1646_v41, %s1761_s0 }
 0x38e   :  { %v1687_v43 = vpop.eup %1686 }
 0x38f   :  { %v350_v45 = vmul.f32 %v1687_v43, %v1679_v24 }
 0x39a   :  { %v355_v44 = vpop.permute.xlu0 %354 }
 0x39b   :  { %375 = vmatpush.msrb.mxu2 %v355_v44 }
 0x39c   :  { %1572 = vmatmul.msk.f32.vlgmr.msrb.gmra.mxu2 %vm309_vm9, %v350_v45 }
 0x3d2   :  { %v345_v46 = vpop.xlane.xlu1 %344 }
 0x3d3   :  { %1688 = vrcp.f32 %v345_v46 }
 0x3d9   :  { %v1689_v50 = vpop.eup %1688 }
 0x3da   :  { %v353_v56 = vmul.f32 %v1689_v50, %v1681_v29  ;;  %v1659_v50 = vld [vmem:[%s2367_s8] ss:$0 sm:$0xff] }
 0x3e0   :  { %v339_v49 = vpop.xlane.xlu1 %338 }
 0x3e8   :  { %v342_v48 = vpop.xlane.xlu2 %341 }
 0x3e9   :  { %1690 = vrcp.f32 %v342_v48 }
 0x3ea   :  { %1692 = vrcp.f32 %v339_v49 }
 0x3ef   :  { %v1691_v51 = vpop.eup %1690 }
 0x3f0   :  { %v1648_v53 = vpop.permute.xlu2 %1647  ;;  %v352_v57 = vmul.f32 %v1691_v51, %v1685_v39  ;;  %v1693_v58 = vpop.eup %1692 }
 0x3f1   :  { %v1650_v54 = vunpack.i.h.bf16 %v1648_v53  ;;  %v1649_v55 = vunpack.i.l.bf16 %v1648_v53  ;;  %v351_v60 = vmul.f32 %v1693_v58, %v1683_v36 }
 0x3f3   :  { %427 = vmatpush.msra.mxu1 %v1649_v55  ;;  %453 = vmatpush.msra.mxu2 %v1650_v54  ;;  %v1660_v55 = vld [vmem:[%s2368_s9] ss:$0 sm:$0xff] }
 0x3f4   :  { %1574 = vmatmul.msk.f32.vlgmr.msra.gmra.mxu1 %vm309_vm9, %v352_v57  ;;  %1575 = vmatmul.msk.f32.vlgmr.msra.gmra.mxu2 %vm309_vm9, %v353_v56 }
 0x3f8   :  { %v381_v59 = vpop.permute.xlu1 %380 }
 0x3f9   :  { %401 = vmatpush.msrb.mxu3 %v381_v59 }
 0x3fa   :  { %1573 = vmatmul.msk.f32.vlgmr.msrb.gmra.mxu3 %vm309_vm9, %v351_v60 }
 0x3fb   :  { %494 = vmatpush.msra.mxu3 %v471_v1 }
 0x3fd   :  { %495 = vmatpush.msra.mxu3 %v470_v2  ;;  %v1661_v2 = vld [vmem:[%s2370_s11] ss:$0 sm:$0xff] }
 0x3ff   :  { %496 = vmatpush.msra.mxu3 %v469_v3 }
 0x401   :  { %497 = vmatpush.msra.mxu3 %v468_v4 }
 0x41f   :  { %v377_v61 = vpop.f32.mrf.mxu2 }
 0x471   :  { %v429_v62 = vpop.f32.mrf.mxu1 }
 0x472   :  { %460 = vrot.lane.b32.xlu0 %v429_v62, %s1762_s23 }
 0x477   :  { %v455_v63 = vpop.f32.mrf.mxu2 }
 0x478   :  { %462 = vrot.lane.b32.xlu2 %v455_v63, %s1762_s23 }
 0x47d   :  { %v403_v9 = vpop.f32.mrf.mxu3 }
 0x4d2   :  { %v463_v8 = vpop.permute.xlu2 %462 }
 0x4d3   :  { %v467_v12 = vsel %vm186_vm8, %v403_v9, %v463_v8 }
 0x4e4   :  { %v461_v6 = vpop.permute.xlu0 %460 }
 0x4e5   :  { %v466_v7 = vsel %vm186_vm8, %v377_v61, %v461_v6 }
 0x4e6   :  { %1576 = vmatmul.msk.f32.vlgmr.msra.gmra.mxu3 %vm75_vm0, %v466_v7 }
 0x4ee   :  { %1577 = vmatmul.msk.f32.gmra.mxu3 %vm75_vm0, %v467_v12  ;;  %v695_v12 = vld [vmem:[%s2371_s12 + $0x38] sm:$0xff] }
 0x4ef   :  { %715 = vmatpush.msrb.mxu1 %v695_v12 }
 0x569   :  { %v499_v14 = vpop.f32.mrf.mxu3 }
 0x56a   :  { %v500_v15 = vadd.f32 %v1658_v13, %v499_v14 }
 0x56c   :  { %v505_v17 = vadd.f32 %v500_v15, %v1913_v47 }
 0x56e   :  { %v509_v18 = vsel %vm75_vm0, %v505_v17, 0.0 }
 0x56f   :  { %510 = vadd.xlane.f32.xlu0 %v509_v18 }
 0x571   :  { %v502_v19 = vpop.f32.mrf.mxu3 }
 0x572   :  { %v503_v20 = vadd.f32 %v1658_v13, %v502_v19 }
 0x574   :  { %v506_v21 = vadd.f32 %v503_v20, %v1917_v52  ;;  %v566_v52 = vld [vmem:[%s2369_s10 + $0x18] sm:$0xff] }
 0x575   :  { %589 = vmatpush.msrb.mxu0 %v566_v52  ;;  %v690_v52 = vld [vmem:[%s2371_s12 + $0x10] sm:$0xff] }
 0x576   :  { %v512_v22 = vsel %vm75_vm0, %v506_v21, 0.0 }
 0x577   :  { %513 = vadd.xlane.f32.xlu2 %v512_v22  ;;  %590 = vmatpush.msrb.mxu0 %v565_v32 }
 0x579   :  { %591 = vmatpush.msrb.mxu0 %v564_v33 }
 0x57b   :  { %592 = vmatpush.msrb.mxu0 %v563_v34 }
 0x5e2   :  { %v511_v23 = vpop.xlane.xlu0 %510 }
 0x5e3   :  { %v515_v24 = vmul.f32 %v511_v23, %v1887_v10 }
 0x5e5   :  { %v517_v25 = vsub.f32 %v505_v17, %v515_v24  ;;  %v694_v17 = vld [vmem:[%s2371_s12 + $0x30] sm:$0xff] }
 0x5e6   :  { %716 = vmatpush.msrb.mxu1 %v694_v17 }
 0x5e7   :  { %v519_v26 = vmul.f32 %v517_v25, %v517_v25 }
 0x5e9   :  { %v521_v27 = vsel %vm75_vm0, %v519_v26, 0.0 }
 0x5ea   :  { %v514_v28 = vpop.xlane.xlu2 %513  ;;  %522 = vadd.xlane.f32.xlu1 %v521_v27 }
 0x5eb   :  { %v516_v47 = vmul.f32 %v514_v28, %v1887_v10 }
 0x5ed   :  { %v518_v29 = vsub.f32 %v506_v21, %v516_v47  ;;  %v693_v21 = vld [vmem:[%s2371_s12 + $0x28] sm:$0xff]  ;;  %v691_v47 = vld [vmem:[%s2371_s12 + $0x18] sm:$0xff] }
 0x5ee   :  { %717 = vmatpush.msrb.mxu1 %v693_v21 }
 0x5ef   :  { %v520_v30 = vmul.f32 %v518_v29, %v518_v29 }
 0x5f1   :  { %v524_v31 = vsel %vm75_vm0, %v520_v30, 0.0 }
 0x5f2   :  { %525 = vadd.xlane.f32.xlu0 %v524_v31 }
 0x65d   :  { %v523_v35 = vpop.xlane.xlu1 %522 }
 0x65e   :  { %v527_v36 = vmul.f32 %v523_v35, %v1887_v10 }
 0x660   :  { %v529_v37 = vadd.f32 1e-05, %v527_v36  ;;  %v689_v36 = vld [vmem:[%s2371_s12 + $0x8] sm:$0xff] }
 0x662   :  { %1694 = vrsqrt.f32 %v529_v37  ;;  %vm537_vm11 = vweird.f32 %v529_v37 }
 0x665   :  { %v526_v38 = vpop.xlane.xlu0 %525 }
 0x666   :  { %v528_v39 = vmul.f32 %v526_v38, %v1887_v10 }
 0x668   :  { %v1695_v40 = vpop.eup %1694  ;;  %v530_v41 = vadd.f32 1e-05, %v528_v39 }
 0x669   :  { %v532_v42 = vmul.f32 %v1695_v40, %v529_v37  ;;  %vm538_vm10 = vweird.f32 %v1695_v40 }
 0x66a   :  { %1696 = vrsqrt.f32 %v530_v41  ;;  %vm539_vm12 = vmor %vm537_vm11, %vm538_vm10  ;;  %vm547_vm14 = vweird.f32 %v530_v41 }
 0x66b   :  { %v533_v43 = vmul.f32 %v1695_v40, %v532_v42 }
 0x66d   :  { %v534_v44 = vmul.f32 0.5, %v533_v43 }
 0x66f   :  { %v535_v45 = vsub.f32 1.5, %v534_v44 }
 0x670   :  { %v1697_v46 = vpop.eup %1696 }
 0x671   :  { %v536_v48 = vmul.f32 %v1695_v40, %v535_v45  ;;  %v542_v49 = vmul.f32 %v1697_v46, %v530_v41  ;;  %vm548_vm13 = vweird.f32 %v1697_v46 }
 0x672   :  { %vm549_vm15 = vmor %vm547_vm14, %vm548_vm13 }
 0x673   :  { %v540_v51 = vsel %vm539_vm12, %v1695_v40, %v536_v48  ;;  %v543_v53 = vmul.f32 %v1697_v46, %v542_v49  ;;  %v688_v40 = vld [vmem:[%s2371_s12] sm:$0xff] }
 0x674   :  { %v551_v54 = vmul.f32 %v540_v51, %v517_v25  ;;  %v692_v25 = vld [vmem:[%s2371_s12 + $0x20] sm:$0xff] }
 0x675   :  { %v544_v56 = vmul.f32 0.5, %v543_v53  ;;  %718 = vmatpush.msrb.mxu1 %v692_v25 }
 0x676   :  { %v556_v57 = vmul.f32 %v1659_v50, %v551_v54  ;;  %v1587_v54 = vld [vmem:[%s2395_s1 + $0x38] sm:$0xff] }
 0x677   :  { %v545_v58 = vsub.f32 1.5, %v544_v56  ;;  %719 = vmatpush.msrb.mxu1 %v691_v47  ;;  %758 = vmatpush.msrb.mxu2 %v1587_v54 }
 0x678   :  { %v561_v59 = vadd.f32 %v1660_v55, %v556_v57 }
 0x679   :  { %v546_v60 = vmul.f32 %v1697_v46, %v545_v58  ;;  %720 = vmatpush.msrb.mxu1 %v690_v52 }
 0x67a   :  { %1578 = vmatmul.msk.f32.vlgmr.msrb.gmra.mxu0 %vm75_vm0, %v561_v59 }
 0x67b   :  { %v550_v61 = vsel %vm549_vm15, %v1697_v46, %v546_v60  ;;  %721 = vmatpush.msrb.mxu1 %v689_v36 }
 0x67c   :  { %v552_v62 = vmul.f32 %v550_v61, %v518_v29 }
 0x67d   :  { %722 = vmatpush.msrb.mxu1 %v688_v40  ;;  %v1585_v40 = vld [vmem:[%s2395_s1 + $0x28] sm:$0xff] }
 0x67e   :  { %v557_v63 = vmul.f32 %v1659_v50, %v552_v62 }
 0x680   :  { %v562_v1 = vadd.f32 %v1660_v55, %v557_v63  ;;  %v1586_v55 = vld [vmem:[%s2395_s1 + $0x30] sm:$0xff] }
 0x681   :  { %759 = vmatpush.msrb.mxu2 %v1586_v55 }
 0x682   :  { %1579 = vmatmul.msk.f32.gmra.mxu0 %vm75_vm0, %v562_v1 }
 0x683   :  { %760 = vmatpush.msrb.mxu2 %v1585_v40 }
 0x6f7   :  { %v594_v3 = vpop.f32.mrf.mxu0 }
 0x6f8   :  { %v2047_v4 = vadd.f32 %v1661_v2, %v594_v3 }
 0x6fa   :  { %v2050_v6 = vmul.f32 0.70710677, %v2047_v4 }
 0x6fc   :  { %v604_v7 = vmul.f32 %v2050_v6, %v2050_v6 }
 0x6fe   :  { %v605_v8 = vmin.f32 %v604_v7, 16.0 }
 0x6ff   :  { %v597_v9 = vpop.f32.mrf.mxu0 }
 0x700   :  { %v606_v13 = vmul.f32 2.1237322e-06, %v605_v8  ;;  %v617_v14 = vmul.f32 3.8918573e-05, %v605_v8  ;;  %v2057_v15 = vadd.f32 %v1661_v2, %v597_v9 }
 0x702   :  { %v607_v18 = vadd.f32 0.00028619796, %v606_v13  ;;  %v618_v19 = vadd.f32 0.001143296, %v617_v14  ;;  %v2063_v20 = vmul.f32 0.70710677, %v2057_v15 }
 0x704   :  { %v608_v22 = vmul.f32 %v607_v18, %v605_v8  ;;  %v619_v23 = vmul.f32 %v618_v19, %v605_v8  ;;  %v644_v24 = vmul.f32 %v2063_v20, %v2063_v20 }
 0x706   :  { %v620_v26 = vadd.f32 0.014752088, %v619_v23  ;;  %v609_v27 = vadd.f32 0.0036580483, %v608_v22  ;;  %v645_v28 = vmin.f32 %v644_v24, 16.0 }
 0x708   :  { %v621_v29 = vmul.f32 %v620_v26, %v605_v8  ;;  %v646_v30 = vmul.f32 2.1237322e-06, %v645_v28  ;;  %v657_v31 = vmul.f32 3.8918573e-05, %v645_v28  ;;  %v610_v33 = vmul.f32 %v609_v27, %v605_v8 }
 0x70a   :  { %v622_v32 = vadd.f32 0.112945676, %v621_v29  ;;  %v647_v34 = vadd.f32 0.00028619796, %v646_v30  ;;  %v658_v35 = vadd.f32 0.001143296, %v657_v31 }
 0x70b   :  { %v611_v42 = vadd.f32 0.05243302, %v610_v33  ;;  %v600_v31 = vmul.f32 0.5, %v2047_v4 }
 0x70c   :  { %v623_v37 = vmul.f32 %v622_v32, %v605_v8  ;;  %v648_v38 = vmul.f32 %v647_v34, %v645_v28  ;;  %v659_v39 = vmul.f32 %v658_v35, %v645_v28 }
 0x70d   :  { %v612_v49 = vmul.f32 %v611_v42, %v605_v8 }
 0x70e   :  { %v624_v41 = vadd.f32 0.4994258, %v623_v37  ;;  %v660_v43 = vadd.f32 0.014752088, %v659_v39  ;;  %v649_v45 = vadd.f32 0.0036580483, %v648_v38 }
 0x70f   :  { %v613_v56 = vadd.f32 0.18741608, %v612_v49  ;;  %v601_v38 = vmul.f32 0.5, %v2057_v15 }
 0x710   :  { %v625_v44 = vmul.f32 %v624_v41, %v605_v8  ;;  %v661_v46 = vmul.f32 %v660_v43, %v645_v28  ;;  %v650_v51 = vmul.f32 %v649_v45, %v645_v28  ;;  %v1662_v41 = vld [vmem:[%s2372_s13] ss:$0 sm:$0xff]  ;;  %v1663_v45 = vld [vmem:[%s2398_s5 + $0x1] ss:$0 sm:$0xff] }
 0x711   :  { %v614_v61 = vmul.f32 %v613_v56, %v605_v8 }
 0x712   :  { %v626_v48 = vadd.f32 1.0, %v625_v44  ;;  %v662_v50 = vadd.f32 0.112945676, %v661_v46  ;;  %v651_v58 = vadd.f32 0.05243302, %v650_v51 }
 0x713   :  { %v615_v7 = vadd.f32 1.1283791, %v614_v61 }
 0x714   :  { %1698 = vrcp.f32 %v626_v48  ;;  %v663_v53 = vmul.f32 %v662_v50, %v645_v28  ;;  %v652_v1 = vmul.f32 %v651_v58, %v645_v28  ;;  %v638_v3 = vand.u32 2147483648, %v626_v48 }
 0x715   :  { %v636_v12 = vand.u32 2147483647, %v626_v48  ;;  %vm632_vm2 = vweird.f32 %v626_v48  ;;  %v616_v19 = vmul.f32 %v615_v7, %v2050_v6 }
 0x716   :  { %v664_v57 = vadd.f32 0.4994258, %v663_v53  ;;  %v653_v13 = vadd.f32 0.18741608, %v652_v1  ;;  %v639_v17 = vor.u32 1.1754944e-38, %v638_v3 }
 0x717   :  { %vm637_vm4 = vcmp.eq.f32.partialorder %v636_v12, 8.507059e+37 }
 0x718   :  { %v665_v59 = vmul.f32 %v664_v57, %v645_v28  ;;  %v654_v22 = vmul.f32 %v653_v13, %v645_v28 }
 0x71a   :  { %v1699_v60 = vpop.eup %1698  ;;  %v666_v63 = vadd.f32 1.0, %v665_v59  ;;  %v655_v47 = vadd.f32 1.1283791, %v654_v22 }
 0x71b   :  { %v628_v62 = vmul.f32 %v1699_v60, %v626_v48  ;;  %vm633_vm1 = vweird.f32 %v1699_v60 }
 0x71c   :  { %1700 = vrcp.f32 %v666_v63  ;;  %vm634_vm3 = vmor %vm632_vm2, %vm633_vm1  ;;  %v678_v27 = vand.u32 2147483648, %v666_v63  ;;  %v676_v30 = vand.u32 2147483647, %v666_v63  ;;  %vm672_vm6 = vweird.f32 %v666_v63 }
 0x71d   :  { %v629_v2 = vsub.f32 1.0, %v628_v62  ;;  %v656_v28 = vmul.f32 %v655_v47, %v2063_v20  ;;  %v1584_v20 = vld [vmem:[%s2395_s1 + $0x20] sm:$0xff] }
 0x71e   :  { %v679_v33 = vor.u32 1.1754944e-38, %v678_v27  ;;  %vm677_vm11 = vcmp.eq.f32.partialorder %v676_v30, 8.507059e+37  ;;  %761 = vmatpush.msrb.mxu2 %v1584_v20 }
 0x71f   :  { %v630_v9 = vmul.f32 %v1699_v60, %v629_v2 }
 0x721   :  { %v631_v14 = vadd.f32 %v1699_v60, %v630_v9 }
 0x722   :  { %v1701_v18 = vpop.eup %1700 }
 0x723   :  { %v635_v21 = vsel %vm634_vm3, %v1699_v60, %v631_v14  ;;  %v668_v23 = vmul.f32 %v1701_v18, %v666_v63  ;;  %vm673_vm5 = vweird.f32 %v1701_v18 }
 0x724   :  { %v640_v8 = vsel %vm637_vm4, %v639_v17, %v635_v21  ;;  %vm674_vm10 = vmor %vm672_vm6, %vm673_vm5 }
 0x725   :  { %v641_v24 = vmul.f32 %v640_v8, %v616_v19  ;;  %v669_v25 = vsub.f32 1.0, %v668_v23 }
 0x727   :  { %v1580_v26 = vclamps-f32 %v641_v24, 1.0  ;;  %v670_v29 = vmul.f32 %v1701_v18, %v669_v25 }
 0x729   :  { %v684_v52 = vadd.f32 1.0, %v1580_v26  ;;  %v671_v32 = vadd.f32 %v1701_v18, %v670_v29 }
 0x72b   :  { %v686_v6 = vmul.f32 %v684_v52, %v600_v31  ;;  %v675_v34 = vsel %vm674_vm10, %v1701_v18, %v671_v32 }
 0x72c   :  { %v680_v35 = vsel %vm677_vm11, %v679_v33, %v675_v34 }
 0x72d   :  { %1582 = vmatmul.msk.f32.vlgmr.msrb.gmra.mxu1 %vm700_vm7, %v686_v6  ;;  %v681_v36 = vmul.f32 %v680_v35, %v656_v28 }
 0x72f   :  { %v1581_v37 = vclamps-f32 %v681_v36, 1.0 }
 0x731   :  { %v685_v39 = vadd.f32 1.0, %v1581_v37 }
 0x733   :  { %v687_v4 = vmul.f32 %v685_v39, %v601_v38 }
 0x735   :  { %1583 = vmatmul.msk.f32.gmra.mxu1 %vm700_vm7, %v687_v4 }
 0x7aa   :  { %v724_v42 = vpop.f32.mrf.mxu1 }
 0x7ab   :  { %v2106_v15 = vadd.f32 %v1662_v41, %v724_v42 }
 0x7ad   :  { %1589 = vmatmul.msk.f32.vlgmr.msrb.gmra.mxu2 %vm75_vm0, %v2106_v15 }
 0x7b2   :  { %v727_v43 = vpop.f32.mrf.mxu1 }
 0x7b3   :  { %v2110_v44 = vadd.f32 %v1662_v41, %v727_v43 }
 0x7b5   :  { %1590 = vmatmul.msk.f32.gmra.mxu2 %vm75_vm0, %v2110_v44 }
 0x830   :  { %v763_v46 = vpop.f32.mrf.mxu2 }
 0x831   :  { %v2117_v48 = vadd.f32 %v1663_v45, %v763_v46 }
 0x833   :  { %775 = vrot.lane.b32.xlu1 %v2117_v48, %s1759_s24  ;;  %771 = vrot.lane.b32.xlu2 %v2117_v48, %s1760_s6 }
 0x838   :  { %v766_v49 = vpop.f32.mrf.mxu2 }
 0x839   :  { %v2123_v50 = vadd.f32 %v1663_v45, %v766_v49  ;;  %v1605_v49 = vld [vmem:[%s2400_s2 + $0x30] sm:$0xff] }
 0x83b   :  { %801 = vrot.lane.b32.xlu1 %v2123_v50, %s1759_s24  ;;  %773 = vrot.lane.b32.xlu0 %v2123_v50, %s1760_s6 }
 0x88d   :  { %v2129_v51 = vpop.permute.xlu2 %771 }
 0x88e   :  { %827 = vrot.lane.b32.xlu0 %v2129_v51, %s1759_s24 }
 0x8a5   :  { %v776_v53 = vpop.permute.xlu1 %775 }
 0x8a6   :  { %1591 = vmatpush.xpose.msk.msrb.mxu3 %vm186_vm8, %v776_v53 }
 0x8a9   :  { %1592 = vmatmul.msk.f32.vlgmr.msrb.gmra.mxu3 %vm186_vm8, %v2117_v48 }
 0x8ad   :  { %v802_v54 = vpop.permute.xlu1 %801  ;;  %v774_v55 = vpop.permute.xlu0 %773 }
 0x8ae   :  { %1593 = vmatpush.xpose.msk.msra.mxu0 %vm186_vm8, %v802_v54  ;;  %853 = vrot.lane.b32.xlu2 %v774_v55, %s1759_s24  ;;  %v1603_v54 = vld [vmem:[%s2400_s2 + $0x20] sm:$0xff] }
 0x8b1   :  { %1594 = vmatmul.msk.f32.vlgmr.msra.gmra.mxu0 %vm186_vm8, %v2123_v50 }
 0x900   :  { %v828_v56 = vpop.permute.xlu0 %827 }
 0x901   :  { %1595 = vmatpush.xpose.msk.msra.mxu2 %vm186_vm8, %v828_v56 }
 0x904   :  { %1596 = vmatmul.msk.f32.vlgmr.msra.gmra.mxu2 %vm186_vm8, %v2129_v51 }
 0x908   :  { %v854_v57 = vpop.permute.xlu2 %853 }
 0x909   :  { %1597 = vmatpush.xpose.msk.msra.mxu3 %vm186_vm8, %v854_v57 }
 0x90c   :  { %1598 = vmatmul.msk.f32.vlgmr.msra.gmra.mxu3 %vm186_vm8, %v774_v55 }
 0x92c   :  { %v798_v58 = vpop.f32.mrf.mxu3 }
 0x92d   :  { %v879_v59 = vmul.f32 0.25, %v798_v58 }
 0x92e   :  { %v824_v9 = vpop.f32.mrf.mxu0 }
 0x92f   :  { %v883_v60 = vadd.f32 %v1954_v0, %v879_v59  ;;  %v880_v13 = vmul.f32 0.25, %v824_v9 }
 0x931   :  { %v887_v61 = vsel %vm309_vm9, %v883_v60, -inf  ;;  %v884_v0 = vadd.f32 %v1968_v11, %v880_v13 }
 0x932   :  { %888 = vmax.xlane.f32.xlu1 %v887_v61  ;;  %v1664_v61 = vld [vmem:[%s2366_s7 + $0x1] ss:$0 sm:$0xff] }
 0x933   :  { %v890_v17 = vsel %vm309_vm9, %v884_v0, -inf }
 0x987   :  { %v850_v62 = vpop.f32.mrf.mxu2 }
 0x988   :  { %v881_v63 = vmul.f32 0.25, %v850_v62 }
 0x98a   :  { %v885_v1 = vadd.f32 %v1975_v16, %v881_v63 }
 0x98c   :  { %v893_v2 = vsel %vm309_vm9, %v885_v1, -inf }
 0x98d   :  { %894 = vmax.xlane.f32.xlu0 %v893_v2 }
 0x98f   :  { %v876_v3 = vpop.f32.mrf.mxu3 }
 0x990   :  { %v882_v7 = vmul.f32 0.25, %v876_v3 }
 0x992   :  { %v886_v12 = vadd.f32 %v1961_v5, %v882_v7 }
 0x994   :  { %v896_v14 = vsel %vm309_vm9, %v886_v12, -inf }
 0x995   :  { %897 = vmax.xlane.f32.xlu2 %v896_v14 }
 0x99d   :  { %891 = vmax.xlane.f32.xlu2 %v890_v17 }
 0x9a5   :  { %v889_v21 = vpop.xlane.xlu1 %888 }
 0x9a6   :  { %v899_v5 = vsub.f32 %v883_v60, %v889_v21 }
 0x9a8   :  { %v903_v11 = vmul.f32 1.442695, %v899_v5  ;;  %v1612_v5 = vld [vmem:[%s2369_s10 + $0x20] sm:$0xff] }
 0x9b5   :  { %1009 = vrot.lane.b32.xlu2 %v774_v55, %s1761_s0 }
 0xa00   :  { %v895_v16 = vpop.xlane.xlu0 %894 }
 0xa01   :  { %v901_v18 = vsub.f32 %v885_v1, %v895_v16 }
 0xa03   :  { %v907_v19 = vmul.f32 1.442695, %v901_v18 }
 0xa05   :  { %1702 = vpow2.f32 %v907_v19 }
 0xa08   :  { %v898_v8 = vpop.xlane.xlu2 %897 }
 0xa09   :  { %v902_v22 = vsub.f32 %v886_v12, %v898_v8 }
 0xa0b   :  { %v1703_v23 = vpop.eup %1702  ;;  %v909_v24 = vmul.f32 1.442695, %v902_v22  ;;  %v1614_v22 = vld [vmem:[%s2369_s10 + $0x30] sm:$0xff] }
 0xa0c   :  { %v917_v25 = vsel %vm309_vm9, %v1703_v23, 0.0 }
 0xa0d   :  { %918 = vadd.xlane.f32.xlu0 %v917_v25  ;;  %1704 = vpow2.f32 %v909_v24 }
 0xa0e   :  { %1706 = vpow2.f32 %v903_v11 }
 0xa10   :  { %v892_v26 = vpop.xlane.xlu2 %891 }
 0xa11   :  { %v900_v47 = vsub.f32 %v884_v0, %v892_v26 }
 0xa13   :  { %v1705_v27 = vpop.eup %1704  ;;  %v905_v30 = vmul.f32 1.442695, %v900_v47 }
 0xa14   :  { %v920_v29 = vsel %vm309_vm9, %v1705_v27, 0.0  ;;  %v1707_v52 = vpop.eup %1706 }
 0xa15   :  { %921 = vadd.xlane.f32.xlu1 %v920_v29  ;;  %1708 = vpow2.f32 %v905_v30  ;;  %v911_v32 = vsel %vm309_vm9, %v1707_v52, 0.0 }
 0xa18   :  { %v1010_v31 = vpop.permute.xlu2 %1009 }
 0xa19   :  { %1030 = vmatpush.msrb.mxu3 %v1010_v31 }
 0xa1b   :  { %v1709_v6 = vpop.eup %1708 }
 0xa1c   :  { %v914_v33 = vsel %vm309_vm9, %v1709_v6, 0.0 }
 0xa1d   :  { %912 = vadd.xlane.f32.xlu1 %v911_v32 }
 0xa21   :  { %983 = vrot.lane.b32.xlu0 %v2129_v51, %s1761_s0 }
 0xa25   :  { %915 = vadd.xlane.f32.xlu1 %v914_v33 }
 0xa29   :  { %931 = vrot.lane.b32.xlu0 %v2117_v48, %s1761_s0  ;;  %v1606_v48 = vld [vmem:[%s2400_s2 + $0x38] sm:$0xff] }
 0xa3e   :  { %957 = vrot.lane.b32.xlu1 %v2123_v50, %s1761_s0  ;;  %v1604_v50 = vld [vmem:[%s2400_s2 + $0x28] sm:$0xff] }
 0xa80   :  { %v919_v28 = vpop.xlane.xlu0 %918 }
 0xa81   :  { %1710 = vrcp.f32 %v919_v28 }
 0xa87   :  { %v1711_v35 = vpop.eup %1710 }
 0xa88   :  { %v922_v34 = vpop.xlane.xlu1 %921  ;;  %v929_v39 = vmul.f32 %v1711_v35, %v1703_v23  ;;  %v1613_v23 = vld [vmem:[%s2369_s10 + $0x28] sm:$0xff] }
 0xa89   :  { %1712 = vrcp.f32 %v922_v34  ;;  %v1666_v34 = vld [vmem:[%s2368_s9 + $0x1] ss:$0 sm:$0xff] }
 0xa8f   :  { %v1713_v36 = vpop.eup %1712 }
 0xa90   :  { %v930_v37 = vmul.f32 %v1713_v36, %v1705_v27  ;;  %v913_v38 = vpop.xlane.xlu1 %912 }
 0xa91   :  { %1714 = vrcp.f32 %v913_v38 }
 0xa92   :  { %1602 = vmatmul.msk.f32.vlgmr.msrb.gmra.mxu3 %vm309_vm9, %v930_v37 }
 0xa93   :  { %v984_v4 = vpop.permute.xlu0 %983 }
 0xa94   :  { %1004 = vmatpush.msrb.mxu2 %v984_v4 }
 0xa95   :  { %1601 = vmatmul.msk.f32.vlgmr.msrb.gmra.mxu2 %vm309_vm9, %v929_v39 }
 0xa97   :  { %v1715_v40 = vpop.eup %1714 }
 0xa98   :  { %v927_v20 = vmul.f32 %v1715_v40, %v1707_v52  ;;  %v916_v42 = vpop.xlane.xlu1 %915  ;;  %v1665_v52 = vld [vmem:[%s2367_s8 + $0x1] ss:$0 sm:$0xff] }
 0xa99   :  { %1716 = vrcp.f32 %v916_v42 }
 0xa9b   :  { %v932_v41 = vpop.permute.xlu0 %931 }
 0xa9c   :  { %952 = vmatpush.msrb.mxu0 %v932_v41 }
 0xa9d   :  { %1599 = vmatmul.msk.f32.vlgmr.msrb.gmra.mxu0 %vm309_vm9, %v927_v20 }
 0xa9e   :  { %1073 = vmatpush.msra.mxu0 %v1606_v48 }
 0xa9f   :  { %v1717_v43 = vpop.eup %1716 }
 0xaa0   :  { %v928_v45 = vmul.f32 %v1717_v43, %v1709_v6  ;;  %1074 = vmatpush.msra.mxu0 %v1605_v49 }
 0xaa2   :  { %1075 = vmatpush.msra.mxu0 %v1604_v50 }
 0xaa4   :  { %1076 = vmatpush.msra.mxu0 %v1603_v54 }
 0xab0   :  { %v958_v46 = vpop.permute.xlu1 %957 }
 0xab1   :  { %978 = vmatpush.msra.mxu1 %v958_v46  ;;  %v1667_v46 = vld [vmem:[%s2370_s11 + $0x1] ss:$0 sm:$0xff] }
 0xab2   :  { %1600 = vmatmul.msk.f32.vlgmr.msra.gmra.mxu1 %vm309_vm9, %v928_v45 }
 0xb15   :  { %v1032_v51 = vpop.f32.mrf.mxu3 }
 0xb16   :  { %1039 = vrot.lane.b32.xlu0 %v1032_v51, %s1762_s23 }
 0xb18   :  { %v1006_v53 = vpop.f32.mrf.mxu2 }
 0xb19   :  { %1037 = vrot.lane.b32.xlu2 %v1006_v53, %s1762_s23  ;;  %s1763_s23 = smov [#allocation2]  }
 0xb1a   :  { %v954_v55 = vpop.f32.mrf.mxu0  ;;  %s1549_s2 = sshll.u32 %s1763_s23, 4  ;;  %s1550_s2 = int_to_ptr.vmem [resolvable:$true] %s1549_s2 }
 0xb2f   :  { %v980_v58 = vpop.f32.mrf.mxu1 }
 0xb73   :  { %v1038_v56 = vpop.permute.xlu2 %1037 }
 0xb74   :  { %v1043_v57 = vsel %vm186_vm8, %v954_v55, %v1038_v56  ;;  %v1628_v56 = vld [vmem:[%s2371_s12 + $0x78] sm:$0xff] }
 0xb75   :  { %1608 = vmatmul.msk.f32.vlgmr.msra.gmra.mxu0 %vm75_vm0, %v1043_v57  ;;  %1299 = vmatpush.msra.mxu2 %v1628_v56 }
 0xb88   :  { %v1040_v59 = vpop.permute.xlu0 %1039 }
 0xb89   :  { %v1044_v60 = vsel %vm186_vm8, %v980_v58, %v1040_v59  ;;  %v1627_v59 = vld [vmem:[%s2371_s12 + $0x70] sm:$0xff] }
 0xb8a   :  { %1609 = vmatmul.msk.f32.gmra.mxu0 %vm75_vm0, %v1044_v60  ;;  %1300 = vmatpush.msra.mxu2 %v1627_v59 }
 0xbf2   :  { %v1078_v62 = vpop.f32.mrf.mxu0 }
 0xbf3   :  { %v1079_v63 = vadd.f32 %v1664_v61, %v1078_v62  ;;  %v1626_v62 = vld [vmem:[%s2371_s12 + $0x68] sm:$0xff] }
 0xbf4   :  { %1301 = vmatpush.msra.mxu2 %v1626_v62 }
 0xbf5   :  { %v1084_v1 = vadd.f32 %v1079_v63, %v2106_v15 }
 0xbf7   :  { %v1090_v2 = vsel %vm75_vm0, %v1084_v1, 0.0 }
 0xbf8   :  { %1091 = vadd.xlane.f32.xlu2 %v1090_v2  ;;  %v1625_v2 = vld [vmem:[%s2371_s12 + $0x60] sm:$0xff] }
 0xbf9   :  { %1302 = vmatpush.msra.mxu2 %v1625_v2 }
 0xc07   :  { %v1081_v3 = vpop.f32.mrf.mxu0 }
 0xc08   :  { %v1082_v7 = vadd.f32 %v1664_v61, %v1081_v3 }
 0xc0a   :  { %v1085_v9 = vadd.f32 %v1082_v7, %v2110_v44  ;;  %v1615_v44 = vld [vmem:[%s2369_s10 + $0x38] sm:$0xff] }
 0xc0b   :  { %1172 = vmatpush.msrb.mxu1 %v1615_v44  ;;  %v1624_v7 = vld [vmem:[%s2371_s12 + $0x58] sm:$0xff] }
 0xc0c   :  { %v1093_v12 = vsel %vm75_vm0, %v1085_v9, 0.0  ;;  %1303 = vmatpush.msra.mxu2 %v1624_v7 }
 0xc0d   :  { %1094 = vadd.xlane.f32.xlu0 %v1093_v12  ;;  %1173 = vmatpush.msrb.mxu1 %v1614_v22 }
 0xc0f   :  { %1174 = vmatpush.msrb.mxu1 %v1613_v23 }
 0xc11   :  { %1175 = vmatpush.msrb.mxu1 %v1612_v5 }
 0xc6b   :  { %v1092_v13 = vpop.xlane.xlu2 %1091 }
 0xc6c   :  { %v1096_v14 = vmul.f32 %v1092_v13, %v1887_v10  ;;  %v1623_v13 = vld [vmem:[%s2371_s12 + $0x50] sm:$0xff] }
 0xc6d   :  { %1304 = vmatpush.msra.mxu2 %v1623_v13 }
 0xc6e   :  { %v1098_v0 = vsub.f32 %v1084_v1, %v1096_v14 }
 0xc70   :  { %v1100_v17 = vmul.f32 %v1098_v0, %v1098_v0 }
 0xc72   :  { %v1102_v16 = vsel %vm75_vm0, %v1100_v17, 0.0 }
 0xc73   :  { %1103 = vadd.xlane.f32.xlu1 %v1102_v16 }
 0xc80   :  { %v1095_v18 = vpop.xlane.xlu0 %1094 }
 0xc81   :  { %v1097_v15 = vmul.f32 %v1095_v18, %v1887_v10 }
 0xc83   :  { %v1099_v19 = vsub.f32 %v1085_v9, %v1097_v15 }
 0xc85   :  { %v1101_v21 = vmul.f32 %v1099_v19, %v1099_v19 }
 0xc87   :  { %v1105_v8 = vsel %vm75_vm0, %v1101_v21, 0.0 }
 0xc88   :  { %1106 = vadd.xlane.f32.xlu2 %v1105_v8 }
 0xce6   :  { %v1104_v24 = vpop.xlane.xlu1 %1103 }
 0xce7   :  { %v1108_v25 = vmul.f32 %v1104_v24, %v1887_v10 }
 0xce9   :  { %v1110_v11 = vadd.f32 1e-05, %v1108_v25 }
 0xceb   :  { %1718 = vrsqrt.f32 %v1110_v11  ;;  %vm1118_vm9 = vweird.f32 %v1110_v11 }
 0xcf1   :  { %v1719_v26 = vpop.eup %1718 }
 0xcf2   :  { %v1113_v27 = vmul.f32 %v1719_v26, %v1110_v11  ;;  %vm1119_vm8 = vweird.f32 %v1719_v26 }
 0xcf3   :  { %vm1120_vm12 = vmor %vm1118_vm9, %vm1119_vm8 }
 0xcf4   :  { %v1114_v47 = vmul.f32 %v1719_v26, %v1113_v27 }
 0xcf6   :  { %v1115_v29 = vmul.f32 0.5, %v1114_v47 }
 0xcf8   :  { %v1116_v30 = vsub.f32 1.5, %v1115_v29 }
 0xcfa   :  { %v1117_v31 = vmul.f32 %v1719_v26, %v1116_v30 }
 0xcfb   :  { %v1107_v6 = vpop.xlane.xlu2 %1106 }
 0xcfc   :  { %v1121_v32 = vsel %vm1120_vm12, %v1719_v26, %v1117_v31  ;;  %v1109_v28 = vmul.f32 %v1107_v6, %v1887_v10 }
 0xcfd   :  { %v1132_v33 = vmul.f32 %v1121_v32, %v1098_v0  ;;  %v1622_v0 = vld [vmem:[%s2371_s12 + $0x48] sm:$0xff] }
 0xcfe   :  { %v1111_v36 = vadd.f32 1e-05, %v1109_v28  ;;  %1305 = vmatpush.msra.mxu2 %v1622_v0 }
 0xcff   :  { %v1137_v35 = vmul.f32 %v1665_v52, %v1132_v33 }
 0xd00   :  { %1720 = vrsqrt.f32 %v1111_v36  ;;  %vm1128_vm14 = vweird.f32 %v1111_v36 }
 0xd01   :  { %v1142_v37 = vadd.f32 %v1666_v34, %v1137_v35 }
 0xd03   :  { %1617 = vmatmul.msk.f32.vlgmr.msrb.gmra.mxu1 %vm75_vm0, %v1142_v37 }
 0xd06   :  { %v1721_v38 = vpop.eup %1720 }
 0xd07   :  { %v1123_v39 = vmul.f32 %v1721_v38, %v1111_v36  ;;  %vm1129_vm13 = vweird.f32 %v1721_v38 }
 0xd08   :  { %vm1130_vm15 = vmor %vm1128_vm14, %vm1129_vm13 }
 0xd09   :  { %v1124_v4 = vmul.f32 %v1721_v38, %v1123_v39 }
 0xd0b   :  { %v1125_v40 = vmul.f32 0.5, %v1124_v4 }
 0xd0d   :  { %v1126_v20 = vsub.f32 1.5, %v1125_v40 }
 0xd0f   :  { %v1127_v41 = vmul.f32 %v1721_v38, %v1126_v20 }
 0xd11   :  { %v1131_v10 = vsel %vm1130_vm15, %v1721_v38, %v1127_v41 }
 0xd12   :  { %v1133_v42 = vmul.f32 %v1131_v10, %v1099_v19  ;;  %v1621_v19 = vld [vmem:[%s2371_s12 + $0x40] sm:$0xff] }
 0xd13   :  { %1306 = vmatpush.msra.mxu2 %v1621_v19 }
 0xd14   :  { %v1138_v43 = vmul.f32 %v1665_v52, %v1133_v42 }
 0xd16   :  { %v1143_v45 = vadd.f32 %v1666_v34, %v1138_v43  ;;  %v1317_v43 = vld [vmem:[%s2373_s14 + $0x18] sm:$0xff] }
 0xd17   :  { %1340 = vmatpush.msra.mxu3 %v1317_v43  ;;  %v1442_v43 = vld [vmem:[%s2375_s16 + $0x18] sm:$0xff] }
 0xd18   :  { %1618 = vmatmul.msk.f32.gmra.mxu1 %vm75_vm0, %v1143_v45  ;;  %v1316_v45 = vld [vmem:[%s2373_s14 + $0x10] sm:$0xff]  ;;  %1461 = vmatpush.msrb.mxu0 %v1442_v43 }
 0xd19   :  { %1341 = vmatpush.msra.mxu3 %v1316_v45 }
 0xd80   :  { %v1177_v48 = vpop.f32.mrf.mxu1 }
 0xd81   :  { %v2222_v49 = vadd.f32 %v1667_v46, %v1177_v48 }
 0xd83   :  { %v2225_v50 = vmul.f32 0.70710677, %v2222_v49 }
 0xd85   :  { %v1187_v51 = vmul.f32 %v2225_v50, %v2225_v50 }
 0xd87   :  { %v1188_v53 = vmin.f32 %v1187_v51, 16.0 }
 0xd89   :  { %v1189_v54 = vmul.f32 2.1237322e-06, %v1188_v53  ;;  %v1200_v55 = vmul.f32 3.8918573e-05, %v1188_v53 }
 0xd8b   :  { %v1190_v57 = vadd.f32 0.00028619796, %v1189_v54  ;;  %v1201_v58 = vadd.f32 0.001143296, %v1200_v55 }
 0xd8d   :  { %v1191_v60 = vmul.f32 %v1190_v57, %v1188_v53  ;;  %v1202_v61 = vmul.f32 %v1201_v58, %v1188_v53 }
 0xd8f   :  { %v1192_v63 = vadd.f32 0.0036580483, %v1191_v60  ;;  %v1203_v1 = vadd.f32 0.014752088, %v1202_v61 }
 0xd91   :  { %v1204_v3 = vmul.f32 %v1203_v1, %v1188_v53  ;;  %v1193_v9 = vmul.f32 %v1192_v63, %v1188_v53 }
 0xd93   :  { %v1205_v12 = vadd.f32 0.112945676, %v1204_v3  ;;  %v1194_v16 = vadd.f32 0.05243302, %v1193_v9 }
 0xd95   :  { %v1206_v14 = vmul.f32 %v1205_v12, %v1188_v53  ;;  %v1180_v17 = vpop.f32.mrf.mxu1  ;;  %v1195_v44 = vmul.f32 %v1194_v16, %v1188_v53 }
 0xd96   :  { %v2250_v15 = vadd.f32 %v1667_v46, %v1180_v17 }
 0xd97   :  { %v1207_v18 = vadd.f32 0.4994258, %v1206_v14  ;;  %v1196_v24 = vadd.f32 0.18741608, %v1195_v44  ;;  %v1314_v44 = vld [vmem:[%s2373_s14] sm:$0xff] }
 0xd98   :  { %v2256_v8 = vmul.f32 0.70710677, %v2250_v15  ;;  %v1184_v16 = vmul.f32 0.5, %v2250_v15  ;;  %v1480_v15 = vld [vmem:[%s2376_s17 + $0x10] sm:$0xff] }
 0xd99   :  { %v1208_v21 = vmul.f32 %v1207_v18, %v1188_v53  ;;  %v1197_v29 = vmul.f32 %v1196_v24, %v1188_v53 }
 0xd9a   :  { %v1227_v23 = vmul.f32 %v2256_v8, %v2256_v8 }
 0xd9b   :  { %v1209_v22 = vadd.f32 1.0, %v1208_v21  ;;  %v1198_v33 = vadd.f32 1.1283791, %v1197_v29  ;;  %v1315_v21 = vld [vmem:[%s2373_s14 + $0x8] sm:$0xff]  ;;  %v1513_v29 = vld [vmem:[%s2378_s19 + $0x18] sm:$0xff]  ;;  %s1551_s14 = sshll.u32 %s2381_s22, 4  ;;  %s1552_s14 = int_to_ptr.hbm [resolvable:$true] %s1551_s14 }
 0xd9c   :  { %v1228_v5 = vmin.f32 %v1227_v23, 16.0  ;;  %1342 = vmatpush.msra.mxu3 %v1315_v21  ;;  %v1478_v23 = vld [vmem:[%s2376_s17] sm:$0xff] }
 0xd9d   :  { %1722 = vrcp.f32 %v1209_v22  ;;  %v1221_v28 = vand.u32 2147483648, %v1209_v22  ;;  %v1219_v36 = vand.u32 2147483647, %v1209_v22  ;;  %vm1215_vm2 = vweird.f32 %v1209_v22 }
 0xd9e   :  { %v1229_v25 = vmul.f32 2.1237322e-06, %v1228_v5  ;;  %v1240_v11 = vmul.f32 3.8918573e-05, %v1228_v5  ;;  %v1199_v20 = vmul.f32 %v1198_v33, %v2225_v50  ;;  %v1183_v50 = vmul.f32 0.5, %v2222_v49  ;;  %1343 = vmatpush.msra.mxu3 %v1314_v44 }
 0xd9f   :  { %v1222_v4 = vor.u32 1.1754944e-38, %v1221_v28  ;;  %vm1220_vm4 = vcmp.eq.f32.partialorder %v1219_v36, 8.507059e+37 }
 0xda0   :  { %v1230_v26 = vadd.f32 0.00028619796, %v1229_v25  ;;  %v1241_v27 = vadd.f32 0.001143296, %v1240_v11  ;;  %1533 = vmatpush.msrb.mxu3 %v1513_v29 }
 0xda2   :  { %v1231_v31 = vmul.f32 %v1230_v26, %v1228_v5  ;;  %v1242_v52 = vmul.f32 %v1241_v27, %v1228_v5 }
 0xda3   :  { %v1723_v47 = vpop.eup %1722 }
 0xda4   :  { %v1211_v30 = vmul.f32 %v1723_v47, %v1209_v22  ;;  %v1243_v6 = vadd.f32 0.014752088, %v1242_v52  ;;  %v1232_v34 = vadd.f32 0.0036580483, %v1231_v31  ;;  %vm1216_vm1 = vweird.f32 %v1723_v47  ;;  %v1479_v22 = vld [vmem:[%s2376_s17 + $0x8] sm:$0xff] }
 0xda5   :  { %vm1217_vm3 = vmor %vm1215_vm2, %vm1216_vm1  ;;  %v1511_v31 = vld [vmem:[%s2378_s19 + $0x8] sm:$0xff]  ;;  %v1669_v52 = vld [vmem:[%s2374_s15] ss:$0 sm:$0xff] }
 0xda6   :  { %v1212_v32 = vsub.f32 1.0, %v1211_v30  ;;  %v1244_v37 = vmul.f32 %v1243_v6, %v1228_v5  ;;  %v1233_v40 = vmul.f32 %v1232_v34, %v1228_v5  ;;  %v1512_v30 = vld [vmem:[%s2378_s19 + $0x10] sm:$0xff] }
 0xda7   :  { %1534 = vmatpush.msrb.mxu3 %v1512_v30 }
 0xda8   :  { %v1213_v35 = vmul.f32 %v1723_v47, %v1212_v32  ;;  %v1245_v39 = vadd.f32 0.112945676, %v1244_v37  ;;  %v1234_v51 = vadd.f32 0.05243302, %v1233_v40  ;;  %v1510_v32 = vld [vmem:[%s2378_s19] sm:$0xff] }
 0xda9   :  { %1535 = vmatpush.msrb.mxu3 %v1511_v31 }
 0xdaa   :  { %v1214_v38 = vadd.f32 %v1723_v47, %v1213_v35  ;;  %v1246_v10 = vmul.f32 %v1245_v39, %v1228_v5  ;;  %v1235_v57 = vmul.f32 %v1234_v51, %v1228_v5 }
 0xdab   :  { %1536 = vmatpush.msrb.mxu3 %v1510_v32 }
 0xdac   :  { %v1218_v41 = vsel %vm1217_vm3, %v1723_v47, %v1214_v38  ;;  %v1247_v48 = vadd.f32 0.4994258, %v1246_v10  ;;  %v1236_v59 = vadd.f32 0.18741608, %v1235_v57 }
 0xdad   :  { %v1223_v42 = vsel %vm1220_vm4, %v1222_v4, %v1218_v41 }
 0xdae   :  { %v1224_v46 = vmul.f32 %v1223_v42, %v1199_v20  ;;  %v1248_v54 = vmul.f32 %v1247_v48, %v1228_v5  ;;  %v1237_v61 = vmul.f32 %v1236_v59, %v1228_v5  ;;  %v1668_v5 = vld [vmem:[%s2372_s13 + $0x1] ss:$0 sm:$0xff]  ;;  %v1670_v42 = vld [vmem:[%s2377_s18] ss:$0 sm:$0xff]  ;;  %v1441_v48 = vld [vmem:[%s2375_s16 + $0x10] sm:$0xff] }
 0xdaf   :  { %1462 = vmatpush.msrb.mxu0 %v1441_v48 }
 0xdb0   :  { %v1619_v53 = vclamps-f32 %v1224_v46, 1.0  ;;  %v1249_v56 = vadd.f32 1.0, %v1248_v54  ;;  %v1238_v2 = vadd.f32 1.1283791, %v1237_v61 }
 0xdb2   :  { %v1267_v55 = vadd.f32 1.0, %v1619_v53  ;;  %1724 = vrcp.f32 %v1249_v56  ;;  %v1261_v1 = vand.u32 2147483648, %v1249_v56  ;;  %v1259_v7 = vand.u32 2147483647, %v1249_v56 }
 0xdb3   :  { %vm1255_vm6 = vweird.f32 %v1249_v56  ;;  %v1239_v12 = vmul.f32 %v1238_v2, %v2256_v8  ;;  %v1481_v8 = vld [vmem:[%s2376_s17 + $0x18] sm:$0xff] }
 0xdb4   :  { %v1269_v58 = vmul.f32 %v1267_v55, %v1183_v50  ;;  %v1262_v49 = vor.u32 1.1754944e-38, %v1261_v1  ;;  %vm1260_vm11 = vcmp.eq.f32.partialorder %v1259_v7, 8.507059e+37  ;;  %1501 = vmatpush.msra.mxu1 %v1481_v8  ;;  %v1440_v50 = vld [vmem:[%s2375_s16 + $0x8] sm:$0xff] }
 0xdb5   :  { %1463 = vmatpush.msrb.mxu0 %v1440_v50 }
 0xdb6   :  { %1630 = vmatmul.msk.f32.vlgmr.msra.gmra.mxu2 %vm700_vm7, %v1269_v58  ;;  %1502 = vmatpush.msra.mxu1 %v1480_v15  ;;  %v1439_v58 = vld [vmem:[%s2375_s16] sm:$0xff] }
 0xdb7   :  { %1464 = vmatpush.msrb.mxu0 %v1439_v58  ;;  %v1671_v58 = vld [vmem:[%s2379_s20] ss:$0 sm:$0xff] }
 0xdb8   :  { %v1725_v60 = vpop.eup %1724  ;;  %1503 = vmatpush.msra.mxu1 %v1479_v22 }
 0xdb9   :  { %v1251_v62 = vmul.f32 %v1725_v60, %v1249_v56  ;;  %vm1256_vm5 = vweird.f32 %v1725_v60 }
 0xdba   :  { %vm1257_vm10 = vmor %vm1255_vm6, %vm1256_vm5  ;;  %1504 = vmatpush.msra.mxu1 %v1478_v23 }
 0xdbb   :  { %v1252_v63 = vsub.f32 1.0, %v1251_v62 }
 0xdbd   :  { %v1253_v3 = vmul.f32 %v1725_v60, %v1252_v63 }
 0xdbf   :  { %v1254_v9 = vadd.f32 %v1725_v60, %v1253_v3 }
 0xdc1   :  { %v1258_v13 = vsel %vm1257_vm10, %v1725_v60, %v1254_v9 }
 0xdc2   :  { %v1263_v14 = vsel %vm1260_vm11, %v1262_v49, %v1258_v13 }
 0xdc3   :  { %v1264_v0 = vmul.f32 %v1263_v14, %v1239_v12 }
 0xdc5   :  { %v1620_v17 = vclamps-f32 %v1264_v0, 1.0 }
 0xdc7   :  { %v1268_v18 = vadd.f32 1.0, %v1620_v17 }
 0xdc9   :  { %v1270_v19 = vmul.f32 %v1268_v18, %v1184_v16 }
 0xdcb   :  { %1631 = vmatmul.msk.f32.gmra.mxu2 %vm700_vm7, %v1270_v19  ;;  %vm1476_vm7 = vcmask 1040384  }
 0xe39   :  { %v1308_v24 = vpop.f32.mrf.mxu2 }
 0xe3a   :  { %v1309_v25 = vadd.f32 %v1668_v5, %v1308_v24 }
 0xe3c   :  { %1632 = vmatmul.msk.f32.vlgmr.msra.gmra.mxu3 %vm75_vm0, %v1309_v25 }
 0xe4e   :  { %v1311_v11 = vpop.f32.mrf.mxu2 }
 0xe4f   :  { %v1312_v26 = vadd.f32 %v1668_v5, %v1311_v11 }
 0xe51   :  { %v1474_v27 = vrot.slane %v1312_v26, 7  ;;  %1633 = vmatmul.msk.f32.gmra.mxu3 %vm75_vm0, %v1312_v26 }
 0xe53   :  { %v1477_v47 = vsel %vm1476_vm7, %v1309_v25, %v1474_v27 }
 0xe54   :  { %1638 = vmatmul.msk.f32.vlgmr.msra.gmra.mxu1 %vm75_vm0, %v1477_v47 }
 0xebf   :  { %v1345_v6 = vpop.f32.mrf.mxu3 }
 0xec0   :  { %v2311_v33 = vadd.f32 %v1669_v52, %v1345_v6 }
 0xec2   :  { %v2314_v28 = vmul.f32 0.70710677, %v2311_v33 }
 0xec4   :  { %v1355_v34 = vmul.f32 %v2314_v28, %v2314_v28 }
 0xec6   :  { %v1356_v35 = vmin.f32 %v1355_v34, 16.0 }
 0xec8   :  { %v1357_v36 = vmul.f32 2.1237322e-06, %v1356_v35  ;;  %v1368_v37 = vmul.f32 3.8918573e-05, %v1356_v35 }
 0xeca   :  { %v1358_v38 = vadd.f32 0.00028619796, %v1357_v36  ;;  %v1369_v39 = vadd.f32 0.001143296, %v1368_v37 }
 0xecc   :  { %v1359_v4 = vmul.f32 %v1358_v38, %v1356_v35  ;;  %v1370_v40 = vmul.f32 %v1369_v39, %v1356_v35 }
 0xece   :  { %v1360_v20 = vadd.f32 0.0036580483, %v1359_v4  ;;  %v1371_v41 = vadd.f32 0.014752088, %v1370_v40 }
 0xed0   :  { %v1372_v10 = vmul.f32 %v1371_v41, %v1356_v35  ;;  %v1361_v45 = vmul.f32 %v1360_v20, %v1356_v35 }
 0xed1   :  { %v1506_v51 = vpop.f32.mrf.mxu1 }
 0xed2   :  { %v1373_v46 = vadd.f32 0.112945676, %v1372_v10  ;;  %v1507_v54 = vadd.f32 %v1670_v42, %v1506_v51  ;;  %v1362_v55 = vadd.f32 0.05243302, %v1361_v45 }
 0xed4   :  { %v1374_v53 = vmul.f32 %v1373_v46, %v1356_v35  ;;  %1726 = vtanh.f32 %v1507_v54  ;;  %v1348_v57 = vpop.f32.mrf.mxu3  ;;  %v1363_v62 = vmul.f32 %v1362_v55, %v1356_v35 }
 0xed5   :  { %v2333_v59 = vadd.f32 %v1669_v52, %v1348_v57 }
 0xed6   :  { %v1375_v56 = vadd.f32 0.4994258, %v1374_v53  ;;  %v1364_v7 = vadd.f32 0.18741608, %v1363_v62 }
 0xed7   :  { %v2336_v61 = vmul.f32 0.70710677, %v2333_v59  ;;  %v1352_v55 = vmul.f32 0.5, %v2333_v59 }
 0xed8   :  { %v1376_v60 = vmul.f32 %v1375_v56, %v1356_v35  ;;  %v1365_v0 = vmul.f32 %v1364_v7, %v1356_v35  ;;  %v1351_v35 = vmul.f32 0.5, %v2311_v33 }
 0xed9   :  { %v1395_v1 = vmul.f32 %v2336_v61, %v2336_v61 }
 0xeda   :  { %v1377_v63 = vadd.f32 1.0, %v1376_v60  ;;  %v1727_v2 = vpop.eup %1726  ;;  %v1366_v44 = vadd.f32 1.1283791, %v1365_v0 }
 0xedb   :  { %v1396_v3 = vmin.f32 %v1395_v1, 16.0  ;;  %1639 = vmatmul.msk.f32.vlgmr.msrb.gmra.mxu3 %vm75_vm0, %v1727_v2 }
 0xedc   :  { %1728 = vrcp.f32 %v1377_v63  ;;  %v1389_v8 = vand.u32 2147483648, %v1377_v63  ;;  %v1387_v23 = vand.u32 2147483647, %v1377_v63  ;;  %vm1383_vm9 = vweird.f32 %v1377_v63 }
 0xedd   :  { %v1397_v9 = vmul.f32 2.1237322e-06, %v1396_v3  ;;  %v1408_v49 = vmul.f32 3.8918573e-05, %v1396_v3  ;;  %v1367_v27 = vmul.f32 %v1366_v44, %v2314_v28 }
 0xede   :  { %v1390_v11 = vor.u32 1.1754944e-38, %v1389_v8  ;;  %vm1388_vm13 = vcmp.eq.f32.partialorder %v1387_v23, 8.507059e+37 }
 0xedf   :  { %v1398_v12 = vadd.f32 0.00028619796, %v1397_v9  ;;  %v1409_v13 = vadd.f32 0.001143296, %v1408_v49 }
 0xee1   :  { %v1399_v16 = vmul.f32 %v1398_v12, %v1396_v3  ;;  %v1410_v18 = vmul.f32 %v1409_v13, %v1396_v3 }
 0xee2   :  { %v1729_v14 = vpop.eup %1728 }
 0xee3   :  { %v1379_v17 = vmul.f32 %v1729_v14, %v1377_v63  ;;  %v1411_v21 = vadd.f32 0.014752088, %v1410_v18  ;;  %v1400_v15 = vadd.f32 0.0036580483, %v1399_v16  ;;  %vm1384_vm8 = vweird.f32 %v1729_v14 }
 0xee4   :  { %vm1385_vm12 = vmor %vm1383_vm9, %vm1384_vm8 }
 0xee5   :  { %v1380_v19 = vsub.f32 1.0, %v1379_v17  ;;  %v1412_v5 = vmul.f32 %v1411_v21, %v1396_v3  ;;  %v1401_v26 = vmul.f32 %v1400_v15, %v1396_v3 }
 0xee7   :  { %v1381_v22 = vmul.f32 %v1729_v14, %v1380_v19  ;;  %v1413_v25 = vadd.f32 0.112945676, %v1412_v5  ;;  %v1402_v32 = vadd.f32 0.05243302, %v1401_v26 }
 0xee9   :  { %v1382_v24 = vadd.f32 %v1729_v14, %v1381_v22  ;;  %v1414_v29 = vmul.f32 %v1413_v25, %v1396_v3  ;;  %v1403_v38 = vmul.f32 %v1402_v32, %v1396_v3 }
 0xeeb   :  { %v1386_v47 = vsel %vm1385_vm12, %v1729_v14, %v1382_v24  ;;  %v1415_v52 = vadd.f32 0.4994258, %v1414_v29  ;;  %v1404_v4 = vadd.f32 0.18741608, %v1403_v38 }
 0xeec   :  { %v1391_v30 = vsel %vm1388_vm13, %v1390_v11, %v1386_v47 }
 0xeed   :  { %v1392_v31 = vmul.f32 %v1391_v30, %v1367_v27  ;;  %v1416_v34 = vmul.f32 %v1415_v52, %v1396_v3  ;;  %v1405_v40 = vmul.f32 %v1404_v4, %v1396_v3 }
 0xeef   :  { %v1634_v6 = vclamps-f32 %v1392_v31, 1.0  ;;  %v1417_v37 = vadd.f32 1.0, %v1416_v34  ;;  %v1406_v42 = vadd.f32 1.1283791, %v1405_v40 }
 0xef1   :  { %v1435_v36 = vadd.f32 1.0, %v1634_v6  ;;  %1730 = vrcp.f32 %v1417_v37  ;;  %v1429_v10 = vand.u32 2147483648, %v1417_v37  ;;  %v1427_v45 = vand.u32 2147483647, %v1417_v37 }
 0xef2   :  { %vm1423_vm15 = vweird.f32 %v1417_v37  ;;  %v1407_v48 = vmul.f32 %v1406_v42, %v2336_v61 }
 0xef3   :  { %v1437_v39 = vmul.f32 %v1435_v36, %v1351_v35  ;;  %v1430_v33 = vor.u32 1.1754944e-38, %v1429_v10  ;;  %vm1428_vm2 = vcmp.eq.f32.partialorder %v1427_v45, 8.507059e+37 }
 0xef5   :  { %1636 = vmatmul.msk.f32.vlgmr.msrb.gmra.mxu0 %vm75_vm0, %v1437_v39 }
 0xef7   :  { %v1731_v28 = vpop.eup %1730 }
 0xef8   :  { %v1419_v20 = vmul.f32 %v1731_v28, %v1417_v37  ;;  %vm1424_vm14 = vweird.f32 %v1731_v28 }
 0xef9   :  { %vm1425_vm1 = vmor %vm1423_vm15, %vm1424_vm14 }
 0xefa   :  { %v1420_v41 = vsub.f32 1.0, %v1419_v20 }
 0xefc   :  { %v1421_v43 = vmul.f32 %v1731_v28, %v1420_v41 }
 0xefe   :  { %v1422_v46 = vadd.f32 %v1731_v28, %v1421_v43 }
 0xf00   :  { %v1426_v51 = vsel %vm1425_vm1, %v1731_v28, %v1422_v46 }
 0xf01   :  { %v1431_v53 = vsel %vm1428_vm2, %v1430_v33, %v1426_v51 }
 0xf02   :  { %v1432_v54 = vmul.f32 %v1431_v53, %v1407_v48 }
 0xf04   :  { %v1635_v50 = vclamps-f32 %v1432_v54, 1.0 }
 0xf06   :  { %v1436_v56 = vadd.f32 1.0, %v1635_v50 }
 0xf08   :  { %v1438_v57 = vmul.f32 %v1436_v56, %v1352_v55 }
 0xf0a   :  { %1637 = vmatmul.msk.f32.gmra.mxu0 %vm75_vm0, %v1438_v57 }
 0xf5e   :  { %v1538_v60 = vpop.f32.mrf.mxu3 }
 0xf5f   :  { %v1539_v61 = vadd.f32 %v1671_v58, %v1538_v60 }
 0xf61   :  { %1541 = vst [vmem:[#allocation2] sm:$0x3] %v1539_v61 }
 0xf62   :  { %1554 = dma.vmem_to_hbm [thread:$0]  %s1550_s2, 32, %s1552_s14, [#allocation3]  }
 0xf72   :  { %v1466_v59 = vpop.f32.mrf.mxu0 }
 0xf73   :  { %1472 = vst [vmem:[%s2380_s21] sm:$0xff] %v1466_v59 }
 0xf87   :  { %v1469_v62 = vpop.f32.mrf.mxu0 }
 0xf88   :  { %1473 = vst [vmem:[%s2380_s21 + $0x8] sm:$0xff] %v1469_v62 }
 0xf89   :  { %1756 = dma.done.wait [#allocation3], 32  }
 0xf8a   :  { %1757 = vsyncadd [#allocation3], 4294967264 }
 0xf8b   :  { %1561 = vsyncpa [#allocation3], 1 }

</bundles_post_ra>
